<compile_context>
chip_gen: v7x
topology: tpu7x:2x2x1
jax: 0.10.0
libtpu: 0.0.40
codegen_flags: <defaults>
</compile_context>

<pallas_src>
import functools
import math

import jax
import jax.numpy as jnp
from jax import lax
from jax.experimental import pallas as pl
from jax.experimental.pallas import tpu as pltpu


# --------------------------- kernel bodies ---------------------------------

def _qkv_proj_kernel(x_ref, w_ref, b_ref, q_ref, k_ref, v_ref, *, hidden):
    # x block: (1, tr, H); fused weight slab (H, 3H) is VMEM-resident.
    x = x_ref[0]                                                    # (tr, H)
    y = jnp.dot(x, w_ref[...], preferred_element_type=jnp.float32) + b_ref[...]
    # Split the fused (tr, 3H) result into Q/K/V; each store is H lanes wide.
    q_ref[0] = y[:, :hidden].astype(q_ref.dtype)          # Q already pre-scaled
    k_ref[0] = y[:, hidden:2 * hidden].astype(k_ref.dtype)
    v_ref[0] = y[:, 2 * hidden:].astype(v_ref.dtype)


def _flash_attn_kernel(q_ref, k_ref, v_ref, o_ref, m_ref, l_ref, acc_ref, *,
                       heads_per_group, head_dim, block_k, kv_valid, exact_div):
    # grid = (B, ng, S//tq, S//tk); kv axis (3) is the online-softmax reduction.
    ki = pl.program_id(3)

    @pl.when(ki == 0)
    def _():
        m_ref[...] = jnp.full_like(m_ref, -jnp.inf)
        l_ref[...] = jnp.zeros_like(l_ref)
        acc_ref[...] = jnp.zeros_like(acc_ref)

    q = q_ref[0]                              # (tq, GH), GH = hp*dh, pre-scaled
    k = k_ref[0]                              # (tk, GH)
    v = v_ref[0]                              # (tk, GH)

    kv_mask = None
    if kv_valid is not None:                  # static: only when S was padded
        kv_pos = ki * block_k + lax.broadcasted_iota(jnp.int32, (1, block_k), 1)
        kv_mask = kv_pos < kv_valid           # (1, tk)

    for h in range(heads_per_group):          # static unroll over heads in group
        lo = h * head_dim
        q_h = q[:, lo:lo + head_dim]
        k_h = k[:, lo:lo + head_dim]
        v_h = v[:, lo:lo + head_dim]

        # s = q_h @ k_h.T with f32 accumulation on the MXU.
        s = lax.dot_general(q_h, k_h, (((1,), (1,)), ((), ())),
                            preferred_element_type=jnp.float32)    # (tq, tk)
        if kv_mask is not None:
            s = jnp.where(kv_mask, s, -jnp.inf)

        m_prev = m_ref[h]                                           # (tq, 1)
        m_new = jnp.maximum(m_prev, jnp.max(s, axis=-1, keepdims=True))
        alpha = jnp.exp(m_prev - m_new)
        p = jnp.exp(s - m_new)                                      # f32 softmax
        l_ref[h] = alpha * l_ref[h] + jnp.sum(p, axis=-1, keepdims=True)
        acc_ref[h] = alpha * acc_ref[h] + jnp.dot(
            p.astype(v_h.dtype), v_h, preferred_element_type=jnp.float32)
        m_ref[h] = m_new

    @pl.when(ki == pl.num_programs(3) - 1)
    def _():
        outs = []
        for h in range(heads_per_group):
            if exact_div:
                o_h = acc_ref[h] / l_ref[h]
            else:
                o_h = acc_ref[h] * pl.reciprocal(l_ref[h], approx=True)
            outs.append(o_h)
        merged = outs[0] if heads_per_group == 1 else jnp.concatenate(outs, axis=-1)
        o_ref[0] = merged.astype(o_ref.dtype)        # (tq, GH) lane-dense store


def _out_proj_kernel(a_ref, w_ref, b_ref, o_ref):
    # Full-K GEMM: (tq, H) @ (H, H) + b; W_o / b_o are VMEM-resident.
    o_ref[0] = (jnp.dot(a_ref[0], w_ref[...], preferred_element_type=jnp.float32)
                + b_ref[...]).astype(o_ref.dtype)


# ------------------------------ wrapper -------------------------------------

def _round_up(x, m):
    return ((x + m - 1) // m) * m


def _fit_tile(pref, total):
    """Largest multiple of 128 that is <= pref and divides total (total%128==0)."""
    t = min(_round_up(pref, 128), total)
    t -= t % 128
    while total % t:
        t -= 128
    return t


def _vmem_limit(need_bytes):
    return int(min(96 * 1024 * 1024, max(32 * 1024 * 1024, 2 * need_bytes)))


def mhsa_pallas(x, params, num_heads, *, tq=256, tk=512):
    """x: (B, S, H). params: PyTorch-convention weights (W: (out,in), b: (out,))."""
    B, S, H = x.shape
    dh = H // num_heads
    assert dh * num_heads == H, "hidden_dim must be divisible by num_heads"
    dtype = x.dtype
    itemsize = jnp.dtype(dtype).itemsize
    inv_sqrt_dh = 1.0 / math.sqrt(float(dh))
    exact_div = bool(dtype == jnp.float32)

    # Head grouping so attention blocks / stores are >= 128 lanes wide.
    if dh % 128 == 0:
        hp = 1
    elif 128 % dh == 0 and num_heads % (128 // dh) == 0:
        hp = 128 // dh
    else:
        hp = num_heads            # fallback: one group = all heads (GH = H)
    ng = num_heads // hp
    GH = hp * dh

    # Pad S to a multiple of 128; padded keys are masked in the flash kernel.
    S_pad = _round_up(S, 128)
    tq = _fit_tile(tq, S_pad)
    tk = _fit_tile(tk, S_pad)
    x_p = x if S_pad == S else jnp.pad(x, ((0, 0), (0, S_pad - S), (0, 0)))
    kv_valid = None if S_pad == S else S

    # Host-side weight prep (one-time; cache outside if weights are static):
    # fuse W_q/W_k/W_v into one (H, 3H) slab, 1/sqrt(dh) folded into Q columns.
    wq_t = jnp.transpose(params["W_q"]) * inv_sqrt_dh
    wk_t = jnp.transpose(params["W_k"])
    wv_t = jnp.transpose(params["W_v"])
    w_qkv = jnp.concatenate([wq_t, wk_t, wv_t], axis=1).astype(dtype)   # (H, 3H)
    b_qkv = jnp.concatenate([params["b_q"] * inv_sqrt_dh,
                             params["b_k"],
                             params["b_v"]]).reshape(1, 3 * H).astype(jnp.float32)
    w_o = jnp.transpose(params["W_o"]).astype(dtype)                    # (H, H)
    b_o = params["b_o"].reshape(1, H).astype(jnp.float32)

    row_spec = pl.BlockSpec((1, tq, H), lambda b, i: (b, i, 0))

    # ---- 1) fused QKV projection: (B, S, H) -> 3 x (B, S, H) ----------------
    # TODO(synk): for very large H (e.g. >2048 on v7x 64MiB VMEM) stream the
    # weight slab in K-tiles instead of keeping it fully resident.
    qkv_shape = jax.ShapeDtypeStruct((B, S_pad, H), dtype)
    s1_need = (w_qkv.size * itemsize + b_qkv.size * 4
               + 2 * 4 * tq * H * itemsize + tq * 3 * H * 4 + (1 << 20))
    s1_cost = pl.CostEstimate(
        flops=2 * B * S_pad * H * 3 * H,
        transcendentals=0,
        bytes_accessed=(x_p.size * itemsize + w_qkv.size * itemsize
                        + b_qkv.size * 4 + 3 * B * S_pad * H * itemsize))
    q, k, v = pl.pallas_call(
        functools.partial(_qkv_proj_kernel, hidden=H),
        out_shape=(qkv_shape, qkv_shape, qkv_shape),
        grid_spec=pltpu.PrefetchScalarGridSpec(
            num_scalar_prefetch=0,
            grid=(B, S_pad // tq),
            in_specs=[
                row_spec,
                pl.BlockSpec((H, 3 * H), lambda b, i: (0, 0)),   # resident slab
                pl.BlockSpec((1, 3 * H), lambda b, i: (0, 0)),   # resident bias
            ],
            out_specs=[row_spec, row_spec, row_spec],
        ),
        compiler_params=pltpu.CompilerParams(
            dimension_semantics=("parallel", "parallel"),
            vmem_limit_bytes=_vmem_limit(s1_need)),
        cost_estimate=s1_cost,
    )(x_p, w_qkv, b_qkv)

    # ---- 2) flash attention with online softmax, hp heads per step ----------
    s2_cost = pl.CostEstimate(
        flops=4 * B * num_heads * S_pad * S_pad * dh,
        transcendentals=2 * B * num_heads * S_pad * S_pad,
        bytes_accessed=(2 * B * S_pad * H * itemsize
                        + 2 * (S_pad // tq) * B * S_pad * H * itemsize))
    attn = pl.pallas_call(
        functools.partial(_flash_attn_kernel,
                          heads_per_group=hp, head_dim=dh, block_k=tk,
                          kv_valid=kv_valid, exact_div=exact_div),
        out_shape=jax.ShapeDtypeStruct((B, S_pad, H), dtype),
        grid_spec=pltpu.PrefetchScalarGridSpec(
            num_scalar_prefetch=0,
            grid=(B, ng, S_pad // tq, S_pad // tk),
            in_specs=[
                pl.BlockSpec((1, tq, GH), lambda b, g, qi, ki: (b, qi, g)),
                pl.BlockSpec((1, tk, GH), lambda b, g, qi, ki: (b, ki, g)),
                pl.BlockSpec((1, tk, GH), lambda b, g, qi, ki: (b, ki, g)),
            ],
            out_specs=pl.BlockSpec((1, tq, GH),
                                   lambda b, g, qi, ki: (b, qi, g)),
            scratch_shapes=[
                pltpu.VMEM((hp, tq, 1), jnp.float32),    # running max m
                pltpu.VMEM((hp, tq, 1), jnp.float32),    # running denom l
                pltpu.VMEM((hp, tq, dh), jnp.float32),   # f32 output accumulator
            ],
        ),
        compiler_params=pltpu.CompilerParams(
            dimension_semantics=("parallel", "parallel", "parallel", "arbitrary")),
        cost_estimate=s2_cost,
    )(q, k, v)

    # ---- 3) output projection: plain full-K GEMM with resident W_o ----------
    s3_need = (w_o.size * itemsize + b_o.size * 4
               + 2 * 2 * tq * H * itemsize + tq * H * 4 + (1 << 20))
    s3_cost = pl.CostEstimate(
        flops=2 * B * S_pad * H * H,
        transcendentals=0,
        bytes_accessed=(2 * B * S_pad * H * itemsize
                        + w_o.size * itemsize + b_o.size * 4))
    out = pl.pallas_call(
        _out_proj_kernel,
        out_shape=jax.ShapeDtypeStruct((B, S_pad, H), dtype),
        grid_spec=pltpu.PrefetchScalarGridSpec(
            num_scalar_prefetch=0,
            grid=(B, S_pad // tq),
            in_specs=[
                row_spec,
                pl.BlockSpec((H, H), lambda b, i: (0, 0)),       # resident W_o
                pl.BlockSpec((1, H), lambda b, i: (0, 0)),       # resident b_o
            ],
            out_specs=row_spec,
        ),
        compiler_params=pltpu.CompilerParams(
            dimension_semantics=("parallel", "parallel"),
            vmem_limit_bytes=_vmem_limit(s3_need)),
        cost_estimate=s3_cost,
    )(attn, w_o, b_o)

    return out if S_pad == S else out[:, :S, :]


# --------------------------- pure-JAX reference -----------------------------

def mhsa_reference(x, params, num_heads):
    B, S, H = x.shape
    dh = H // num_heads

    def lin(t, w, b):      # PyTorch convention: w is (out, in)
        return t @ w.T + b

    q = lin(x, params["W_q"], params["b_q"]).reshape(B, S, num_heads, dh).transpose(0, 2, 1, 3)
    k = lin(x, params["W_k"], params["b_k"]).reshape(B, S, num_heads, dh).transpose(0, 2, 1, 3)
    v = lin(x, params["W_v"], params["b_v"]).reshape(B, S, num_heads, dh).transpose(0, 2, 1, 3)
    s = jnp.einsum('bhqd,bhkd->bhqk', q, k) / jnp.sqrt(jnp.float32(dh))
    p = jax.nn.softmax(s, axis=-1)
    o = jnp.einsum('bhqk,bhkd->bhqd', p, v).transpose(0, 2, 1, 3).reshape(B, S, H)
    return lin(o, params["W_o"], params["b_o"])


if __name__ == "__main__":
    # Small but lane-friendly shapes consistent with the module
    # (hidden divisible by num_heads; head_dim = 64 matches the PyTorch default).
    B, S, H, NH = 2, 128, 256, 4
    key = jax.random.PRNGKey(0)
    keys = jax.random.split(key, 9)
    scale = 1.0 / math.sqrt(H)

    x = jax.random.normal(keys[0], (B, S, H), dtype=jnp.float32)
    params = {
        "W_q": jax.random.normal(keys[1], (H, H), jnp.float32) * scale,
        "b_q": jax.random.normal(keys[2], (H,), jnp.float32) * 0.1,
        "W_k": jax.random.normal(keys[3], (H, H), jnp.float32) * scale,
        "b_k": jax.random.normal(keys[4], (H,), jnp.float32) * 0.1,
        "W_v": jax.random.normal(keys[5], (H, H), jnp.float32) * scale,
        "b_v": jax.random.normal(keys[6], (H,), jnp.float32) * 0.1,
        "W_o": jax.random.normal(keys[7], (H, H), jnp.float32) * scale,
        "b_o": jax.random.normal(keys[8], (H,), jnp.float32) * 0.1,
    }

    ref = mhsa_reference(x, params, NH)

    # f32 path (exact softmax division): tight correctness check.
    out = jax.block_until_ready(mhsa_pallas(x, params, NH))
    assert out.shape == (B, S, H)
    err = jnp.max(jnp.abs(out - ref))
    assert jnp.allclose(out, ref, atol=2e-3, rtol=2e-3), f"f32 mismatch, max err {err}"

    # Ragged sequence (S not a multiple of 128): exercises padding + key mask.
    S_r = 100
    x_r = jax.random.normal(keys[0], (1, S_r, H), dtype=jnp.float32)
    ref_r = mhsa_reference(x_r, params, NH)
    out_r = jax.block_until_ready(mhsa_pallas(x_r, params, NH))
    err_r = jnp.max(jnp.abs(out_r - ref_r))
    assert jnp.allclose(out_r, ref_r, atol=2e-3, rtol=2e-3), \
        f"ragged-S mismatch, max err {err_r}"

    # bf16 MXU path (operands bf16, accumulation & softmax in f32): loose check.
    out_bf16 = jax.block_until_ready(mhsa_pallas(x.astype(jnp.bfloat16), params, NH))
    assert out_bf16.shape == (B, S, H) and out_bf16.dtype == jnp.bfloat16
    err_bf = jnp.max(jnp.abs(out_bf16.astype(jnp.float32) - ref))
    assert jnp.allclose(out_bf16.astype(jnp.float32), ref, atol=1e-1, rtol=1e-1), \
        f"bf16 mismatch, max err {err_bf}"

    print("KERNEL_OK")
</pallas_src>

<mosaic_0001>
module attributes {stable_mosaic.version = 11 : i64} {
  func.func @_qkv_proj_kernel(%arg0: i32, %arg1: i32, %arg2: memref<1x128x256xf32, #tpu.memory_space<vmem>>, %arg3: memref<256x768xf32, #tpu.memory_space<vmem>>, %arg4: memref<1x768xf32, #tpu.memory_space<vmem>>, %arg5: memref<1x128x256xf32, #tpu.memory_space<vmem>>, %arg6: memref<1x128x256xf32, #tpu.memory_space<vmem>>, %arg7: memref<1x128x256xf32, #tpu.memory_space<vmem>>) attributes {dimension_semantics = [#tpu.dimension_semantics<parallel>, #tpu.dimension_semantics<parallel>], iteration_bounds = array<i64: 2, 1>, scalar_prefetch = 0 : i64, scratch_operands = 0 : i64, tpu.core_type = #tpu.core_type<tc>, window_params = [{transform_indices = @transform_0, window_bounds = array<i64: 1, 128, 256>}, {pipeline_mode = #tpu.pipeline_mode<synchronous>, transform_indices = @transform_1, window_bounds = array<i64: 256, 768>}, {pipeline_mode = #tpu.pipeline_mode<synchronous>, transform_indices = @transform_2, window_bounds = array<i64: 1, 768>}, {transform_indices = @transform_3, window_bounds = array<i64: 1, 128, 256>}, {transform_indices = @transform_4, window_bounds = array<i64: 1, 128, 256>}, {transform_indices = @transform_5, window_bounds = array<i64: 1, 128, 256>}]} {
    %c0 = arith.constant 0 : index
    %c0_0 = arith.constant 0 : index
    %c0_1 = arith.constant 0 : index
    %0 = vector.load %arg2[%c0, %c0_0, %c0_1] : memref<1x128x256xf32, #tpu.memory_space<vmem>>, vector<1x128x256xf32>
    %1 = vector.shape_cast %0 : vector<1x128x256xf32> to vector<128x256xf32>
    %c0_2 = arith.constant 0 : index
    %c0_3 = arith.constant 0 : index
    %2 = vector.load %arg3[%c0_2, %c0_3] : memref<256x768xf32, #tpu.memory_space<vmem>>, vector<256x768xf32>
    %cst = arith.constant dense<0.000000e+00> : vector<128x768xf32>
    %3 = tpu.matmul %1, %2, %cst {dimension_numbers = #tpu.dot_dimension_numbers<[1], [0], [0], [1], [0, 0, 1, 1], [], []>} : vector<128x256xf32>, vector<256x768xf32>, vector<128x768xf32> -> vector<128x768xf32>
    %c0_4 = arith.constant 0 : index
    %c0_5 = arith.constant 0 : index
    %4 = vector.load %arg4[%c0_4, %c0_5] : memref<1x768xf32, #tpu.memory_space<vmem>>, vector<1x768xf32>
    %5 = vector.broadcast %4 : vector<1x768xf32> to vector<128x768xf32>
    %6 = arith.addf %3, %5 : vector<128x768xf32>
    %7 = vector.extract_strided_slice %6 {offsets = [0, 0], sizes = [128, 256], strides = [1, 1]} : vector<128x768xf32> to vector<128x256xf32>
    %c0_6 = arith.constant 0 : index
    %c0_7 = arith.constant 0 : index
    %c0_8 = arith.constant 0 : index
    %8 = vector.load %arg5[%c0_6, %c0_7, %c0_8] : memref<1x128x256xf32, #tpu.memory_space<vmem>>, vector<1x128x256xf32>
    %9 = vector.shape_cast %8 : vector<1x128x256xf32> to vector<128x256xf32>
    %10 = vector.shape_cast %7 : vector<128x256xf32> to vector<1x128x256xf32>
    tpu.vector_store %arg5[%c0_6, %c0_7, %c0_8], %10 {strides = array<i32>} : memref<1x128x256xf32, #tpu.memory_space<vmem>>, vector<1x128x256xf32>,
    %11 = vector.extract_strided_slice %6 {offsets = [0, 256], sizes = [128, 256], strides = [1, 1]} : vector<128x768xf32> to vector<128x256xf32>
    %c0_9 = arith.constant 0 : index
    %c0_10 = arith.constant 0 : index
    %c0_11 = arith.constant 0 : index
    %12 = vector.load %arg6[%c0_9, %c0_10, %c0_11] : memref<1x128x256xf32, #tpu.memory_space<vmem>>, vector<1x128x256xf32>
    %13 = vector.shape_cast %12 : vector<1x128x256xf32> to vector<128x256xf32>
    %14 = vector.shape_cast %11 : vector<128x256xf32> to vector<1x128x256xf32>
    tpu.vector_store %arg6[%c0_9, %c0_10, %c0_11], %14 {strides = array<i32>} : memref<1x128x256xf32, #tpu.memory_space<vmem>>, vector<1x128x256xf32>,
    %15 = vector.extract_strided_slice %6 {offsets = [0, 512], sizes = [128, 256], strides = [1, 1]} : vector<128x768xf32> to vector<128x256xf32>
    %c0_12 = arith.constant 0 : index
    %c0_13 = arith.constant 0 : index
    %c0_14 = arith.constant 0 : index
    %16 = vector.load %arg7[%c0_12, %c0_13, %c0_14] : memref<1x128x256xf32, #tpu.memory_space<vmem>>, vector<1x128x256xf32>
    %17 = vector.shape_cast %16 : vector<1x128x256xf32> to vector<128x256xf32>
    %18 = vector.shape_cast %15 : vector<128x256xf32> to vector<1x128x256xf32>
    tpu.vector_store %arg7[%c0_12, %c0_13, %c0_14], %18 {strides = array<i32>} : memref<1x128x256xf32, #tpu.memory_space<vmem>>, vector<1x128x256xf32>,
    return
  }
  func.func @transform_0(%arg0: i32, %arg1: i32) -> (i32, i32, i32) {
    %c0_i32 = arith.constant 0 : i32
    %c0_i32_0 = arith.constant 0 : i32
    return %arg0, %arg1, %c0_i32 : i32, i32, i32
  }
  func.func @transform_1(%arg0: i32, %arg1: i32) -> (i32, i32) {
    %c0_i32 = arith.constant 0 : i32
    %c0_i32_0 = arith.constant 0 : i32
    %c0_i32_1 = arith.constant 0 : i32
    return %c0_i32, %c0_i32_0 : i32, i32
  }
  func.func @transform_2(%arg0: i32, %arg1: i32) -> (i32, i32) {
    %c0_i32 = arith.constant 0 : i32
    %c0_i32_0 = arith.constant 0 : i32
    %c0_i32_1 = arith.constant 0 : i32
    return %c0_i32, %c0_i32_0 : i32, i32
  }
  func.func @transform_3(%arg0: i32, %arg1: i32) -> (i32, i32, i32) {
    %c0_i32 = arith.constant 0 : i32
    %c0_i32_0 = arith.constant 0 : i32
    return %arg0, %arg1, %c0_i32 : i32, i32, i32
  }
  func.func @transform_4(%arg0: i32, %arg1: i32) -> (i32, i32, i32) {
    %c0_i32 = arith.constant 0 : i32
    %c0_i32_0 = arith.constant 0 : i32
    return %arg0, %arg1, %c0_i32 : i32, i32, i32
  }
  func.func @transform_5(%arg0: i32, %arg1: i32) -> (i32, i32, i32) {
    %c0_i32 = arith.constant 0 : i32
    %c0_i32_0 = arith.constant 0 : i32
    return %arg0, %arg1, %c0_i32 : i32, i32, i32
  }
}

</mosaic_0001>

<bundles_post_ra>
// kernel: tpu_custom_call.1
= control target key start
LH: loop header
LB: loop body
LE: loop exit
PB: predicated region body
PF: predicated region fallthrough
CT: control target
= control target key end

     0   :  { %s2664_s0 = inlined_call_operand.hbm [shape: f32[2,128,256], index: 0, kind: input, shape index: {}]   ;;  %s2665_s1 = inlined_call_operand.hbm [shape: f32[256,768], index: 1, kind: input, shape index: {}]   ;;  %s2666_s2 = inlined_call_operand.vmem [shape: f32[1,768], index: 2, kind: input, shape index: {}]   ;;  %s2667_s3 = inlined_call_operand.hbm [shape: f32[2,128,256], index: 3, kind: output, shape index: {0}]   ;;  %s2668_s4 = inlined_call_operand.hbm [shape: f32[2,128,256], index: 4, kind: output, shape index: {1}]   ;;  %s2669_s5 = inlined_call_operand.hbm [shape: f32[2,128,256], index: 5, kind: output, shape index: {2}]  }
   0x1   :  { %2674 = sst [smem:[#allocation15_spill]] %s2664_s0 }
   0x2   :  { %11 = vsyncpa [#allocation3], 0 }
   0x3   :  { %13 = vsyncpa [#allocation3 + $0x1], 0 }
   0x4   :  { %14 = vsyncpa [#allocation6], 0 }
   0x5   :  { %15 = vsyncpa [#allocation4], 0 }
   0x6   :  { %17 = vsyncpa [#allocation4 + $0x1], 0 }
   0x7   :  { %18 = vsyncpa [#allocation9], 0 }
   0x8   :  { %20 = vsyncpa [#allocation9 + $0x1], 0  ;;  %s1956_s18 = smov 0   ;;  %s1958_s19 = smov 0  }
   0x9   :  { %s1960_s20 = smov 0   ;;  %s1962_s21 = smov 0  }
   0xa   :  { %s1964_s22 = smov 0   ;;  %s1966_s23 = smov 0  }
   0xb LB: > { %s1987_s24 = sadd.s32 4294967295, %s1913_s23   ;;  %s2673_s25 = sadd.s32 4294967294, %s1913_s23   ;;  %s1913_s23 = sphi %s1966_s23, %s26_s23   ;;  %s1909_s22 = sphi %s1964_s22, %s2697_s22   ;;  %s1905_s21 = sphi %s1962_s21, %s2696_s21   ;;  %s1901_s20 = sphi %s1960_s20, %s2695_s20   ;;  %s1897_s19 = sphi %s1958_s19, %s2694_s19   ;;  %s1893_s18 = sphi %s1956_s18, %s2693_s18  }
   0xc   : > { %p60_p0 = scmp.ne.s32.totalorder %s1897_s19, %s1893_s18  ;;  %p2670_p1 = scmp.eq.s32.totalorder %s1987_s24, 0 }
   0xd   : > { %p134_p3 = scmp.eq.s32.totalorder %s2673_s25, 1  ;;  %p1369_p5 = scmp.ge.s32.totalorder %s1913_s23, 1 }
   0xe   : > { %p1998_p4 = por %p2670_p1, %p60_p0  ;;  %p197_p7 = scmp.lt.s32.totalorder %s1913_s23, 3 }
   0xf   : > { %p2003_p6 = por %p134_p3, %p60_p0  ;;  %s1915_s29 = smov [#allocation5]  }
  0x10   : > { %s2675_s26 = scalar_select %p1998_p4, 1, 0 }
  0x11   : > { %s2676_s27 = scalar_select %p2003_p6, 1, 0 }
  0x12   : > { %p2008_p8 = pnand %p1369_p5, %p197_p7  ;;  %s209_s30 = sshll.u32 %s1915_s29, 4  ;;  %s210_s30 = int_to_ptr.vmem [resolvable:$true] %s209_s30 }
  0x13   : > { %s38_s7 = sadd.s32 1, %s1909_s22  ;;  %s1709_s10 = scalar_lea.hbm %s2665_s1, 24576 }
  0x14   : > { %s2677_s28 = scalar_select %p2008_p8, 1, 0 }
  0x15   : > { %p1632_p9 = pneg %p2008_p8  ;;  %p1710_p12 = scmp.ne.s32.totalorder %s2665_s1, %s1709_s10 }
  0x16   : > { %p1716_p5 = scmp.lt.u32.totalorder %s1709_s10, %s2665_s1 }
  0x17   : > { %p2017_p11 = pnand %p1632_p9, %p2670_p1 }
  0x19   : > { %p1711_p13 = pneg %p2017_p11 }
  0x1b   : > { %p1712_p0 = pnand %p1711_p13, %p1710_p12 }
  0x1d   : > { %p1713_p3 = pneg %p1712_p0 }
  0x1f   : > { %p1718_p7 = pnand %p1716_p5, %p1713_p3 }
  0x21   : > { %1721 = shalt.err (!%p1718_p7)
}
  0x22   : > { %s1722_s15 = scalar_lea.vmem %s210_s30, 24576  ;;  %p1730_p2 = scmp.lt.s32.totalorder %s210_s30, %s210_s30 }
  0x23   : > { %p1723_p9 = scmp.ne.s32.totalorder %s210_s30, %s1722_s15  ;;  %p1731_p6 = scmp.lt.s32.totalorder %s1722_s15, %s1722_s15 }
  0x25   : > { %p1725_p10 = pnand %p1723_p9, %p1711_p13  ;;  %p1732_p4 = por %p1731_p6, %p1730_p2 }
  0x27   : > { %p1726_p1 = pneg %p1725_p10 }
  0x29   : > { %p1733_p8 = pnand %p1732_p4, %p1726_p1 }
  0x2b   : > { %1736 = shalt.err (!%p1733_p8)
}
  0x2c   : > { %s1916_s16 = smov 768   ;;  %s1917_s17 = smov 48  }
  0x2d   : > { %1635 = dma.hbm_to_vmem [thread:$0]  (!%p2017_p11), %s2665_s1, 24576, %s210_s30, [#allocation6], %s1916_s16, %s1916_s16, %s1917_s17  }
  0x2e   : > { %p40_p1 = scmp.ge.s32.totalorder %s38_s7, 2  ;;  %s47_s9 = sadd.s32 1, %s1901_s20 }
  0x2f   : > { %p54_p2 = scmp.ne.s32.totalorder %s1901_s20, %s1897_s19  ;;  %p55_p4 = scmp.eq.s32.totalorder %s1913_s23, 0 }
  0x30   : > { %s2699_s7 = smov (%p40_p1, %s38_s7), 0  ;;  %p2680_p8 = scmp.eq.s32.totalorder %s1987_s24, 1 }
  0x31   : > { %p2044_p6 = por %p55_p4, %p54_p2  ;;  %s42_s6 = ssub.s32 %s1909_s22, %s2699_s7 }
  0x32   : > { %p2050_p10 = por %p2680_p8, %p54_p2  ;;  %p1651_p12 = scmp.lt.s32.totalorder %s1913_s23, 2 }
  0x33   : > { %p45_p11 = scmp.eq.s32.totalorder %s42_s6, 0  ;;  %s226_s30 = sand.u32 1, %s1901_s20  }
  0x34   : > { %s1372_s12 = sshll.u32 %s226_s30, 8  ;;  %s1392_s14 = sshll.u32 %s1909_s22, 12 }
  0x35   : > { %s2059_s13 = scalar_select %p45_p11, %s1901_s20, %s47_s9  }
  0x36   : > { %s2682_s0 = sld [smem:[#allocation15_spill]]  ;;  %s230_s29 = scalar_lea.vmem [#allocation2], %s1372_s12 }
  0x37   : > { %s240_s8 = sshll.u32 %s230_s29, 4  ;;  %p2071_p13 = pnand %p1651_p12, %p2044_p6  ;;  %s2067_s8 = int_to_ptr.vmem [resolvable:$true] %s240_s8 }
  0x38   : > { %s2075_s9 = scalar_lea.sflag [#allocation3], %s226_s30 }
  0x39   : > { %p1739_p3 = pneg %p2071_p13 }
  0x3c   : > { %s2065_s17 = scalar_lea.hbm %s2682_s0, %s1392_s14  ;;  %s1742_s10 = scalar_lea.hbm %s2682_s0, 8192 }
  0x3d   : > { %s1737_s15 = scalar_lea.hbm %s2065_s17, 4096  ;;  %p1743_p9 = scmp.lt.u32.totalorder %s2065_s17, %s2682_s0 }
  0x3e   : > { %p1738_p0 = scmp.ne.s32.totalorder %s2065_s17, %s1737_s15  ;;  %p1744_p1 = scmp.lt.u32.totalorder %s1742_s10, %s1737_s15 }
  0x3f   : > { %p1746_p4 = scmp.lt.u32.totalorder %s1737_s15, %s2065_s17 }
  0x40   : > { %p1740_p5 = pnand %p1739_p3, %p1738_p0  ;;  %p1745_p2 = por %p1744_p1, %p1743_p9 }
  0x42   : > { %p1741_p7 = pneg %p1740_p5  ;;  %p1747_p6 = por %p1746_p4, %p1745_p2 }
  0x44   : > { %p1748_p8 = pnand %p1747_p6, %p1741_p7 }
  0x46   : > { %1751 = shalt.err (!%p1748_p8)
}
  0x47   : > { %s1752_s30 = scalar_lea.vmem %s2067_s8, 4096  ;;  %s1918_s12 = smov [#allocation2]  }
  0x48   : > { %p1753_p12 = scmp.ne.s32.totalorder %s2067_s8, %s1752_s30  ;;  %s1757_s14 = sshll.u32 %s1918_s12, 4  ;;  %s1758_s14 = int_to_ptr.vmem [resolvable:$false] %s1757_s14 }
  0x49   : > { %s1759_s16 = scalar_lea.vmem %s1758_s14, 8192  ;;  %p1760_p5 = scmp.lt.s32.totalorder %s2067_s8, %s1758_s14 }
  0x4a   : > { %p1755_p11 = pnand %p1753_p12, %p1739_p3  ;;  %p1761_p9 = scmp.lt.s32.totalorder %s1759_s16, %s1752_s30 }
  0x4c   : > { %p1756_p0 = pneg %p1755_p11  ;;  %p1762_p1 = por %p1761_p9, %p1760_p5 }
  0x4e   : > { %p1763_p2 = pnand %p1762_p1, %p1756_p0 }
  0x50   : > { %1766 = shalt.err (!%p1763_p2)
}
  0x51   : > { %s1919_s15 = smov 256   ;;  %s1920_s10 = smov 16  }
  0x52   : > { %1639 = dma.hbm_to_vmem [thread:$0]  (!%p2071_p13), %s2065_s17, 4096, %s2067_s8, %s2075_s9, %s1919_s15, %s1919_s15, %s1920_s10  }
  0x53   : > { %p2684_p3 = scmp.ne.s32.totalorder %s2677_s28, 0 }
  0x54   : > { %s2106_s29 = sand.u32 (!%p2684_p3), 1, %s1897_s19   ;;  %p2685_p7 = scmp.ne.s32.totalorder (!%p2684_p3), %s2675_s26, 0 }
  0x55   : > { %252 = sbr.rel (%p2684_p3) target bundleno = 509 (0x1fd), region = 32  ;;  %s2109_s30 = sshll.u32 (!%p2684_p3), %s2106_s29, 8 }
  0x56   : > { %s255_s12 = scalar_lea.sflag (!%p2684_p3), [#allocation3], %s2106_s29  ;;  %s2113_s14 = scalar_lea.vmem (!%p2684_p3), [#allocation2], %s2109_s30 }
  0x5c   : > { %1876 = dma.done.wait (%p2685_p7), %s255_s12, 4096  }
  0x5d   : > { %1878 = vsyncadd (%p2685_p7), %s255_s12, 4294963200  ;;  %p2686_p13 = scmp.eq.s32.totalorder %s1987_s24, 0 }
  0x5f   : > { %1880 = dma.done.wait (%p2686_p13), [#allocation6], 24576   ;;  %p2687_p4 = pmov %p2686_p13 }
  0x60   : > { %v336_v0 = vld [vmem:[#allocation5 + $0x8] sm:$0xff]  ;;  %v342_v1 = vld [vmem:[#allocation5 + $0x38] sm:$0xff]  ;;  %v335_v5 = vld [vmem:[#allocation5] sm:$0xff]  ;;  %s2322_s17 = scalar_lea.vmem [#allocation7], %s2109_s30  ;;  %s2327_s8 = scalar_lea.vmem [#allocation8], %s2109_s30 }
  0x61   : > { %1882 = vsyncadd (%p2687_p4), [#allocation6], 4294942720  ;;  %v338_v2 = vld [vmem:[#allocation5 + $0x18] sm:$0xff]  ;;  %v1396_v3 = vpack.c.bf16 %v342_v1, %v336_v0  ;;  %v344_v4 = vld [vmem:[#allocation5 + $0x48] sm:$0xff]  ;;  %s2443_s9 = sshll.u32 %s1905_s21, 12  ;;  %s1165_s16 = sshll.u32 %s2322_s17, 4  ;;  %s2467_s16 = int_to_ptr.vmem [resolvable:$true] %s1165_s16 }
  0x62   : > { %v341_v6 = vld [vmem:[#allocation5 + $0x30] sm:$0xff]  ;;  %v1460_v7 = vpack.c.bf16 %v344_v4, %v338_v2  ;;  %v343_v10 = vld [vmem:[#allocation5 + $0x40] sm:$0xff]  ;;  %v348_v11 = vld [vmem:[#allocation5 + $0x68] sm:$0xff]  ;;  %s1184_s15 = sshll.u32 %s2327_s8, 4  ;;  %s2465_s12 = scalar_lea.hbm %s2667_s3, %s2443_s9  ;;  %s2477_s15 = int_to_ptr.vmem [resolvable:$true] %s1184_s15 }
  0x63   : > { %v1398_v8 = vpack.c.bf16 %v341_v6, %v335_v5  ;;  %v337_v9 = vld [vmem:[#allocation5 + $0x10] sm:$0xff]  ;;  %1397 = vmatprep.subr.bf16.mxu0 %v1396_v3  ;;  %v354_v13 = vld [vmem:[#allocation5 + $0x98] sm:$0xff]  ;;  %v356_v15 = vld [vmem:[#allocation5 + $0xa8] sm:$0xff]  ;;  %s2475_s28 = scalar_lea.hbm %s2668_s4, %s2443_s9  ;;  %s1767_s10 = scalar_lea.vmem %s2467_s16, 4096 }
  0x64   : > { %v1462_v12 = vpack.c.bf16 %v343_v10, %v337_v9  ;;  %v350_v14 = vld [vmem:[#allocation5 + $0x78] sm:$0xff]  ;;  %1461 = vmatprep.subr.bf16.mxu1 %v1460_v7  ;;  %v1400_v16 = vpack.c.bf16 %v354_v13, %v348_v11  ;;  %v347_v18 = vld [vmem:[#allocation5 + $0x60] sm:$0xff]  ;;  %v353_v19 = vld [vmem:[#allocation5 + $0x90] sm:$0xff]  ;;  %p1768_p6 = scmp.ne.s32.totalorder %s2467_s16, %s1767_s10 }
  0x65   : > { %1399 = vmatpush1.bf16.msra.mxu0 %v1398_v8  ;;  %v1464_v17 = vpack.c.bf16 %v356_v15, %v350_v14  ;;  %v349_v20 = vld [vmem:[#allocation5 + $0x70] sm:$0xff]  ;;  %v1402_v21 = vpack.c.bf16 %v353_v19, %v347_v18  ;;  %v355_v22 = vld [vmem:[#allocation5 + $0xa0] sm:$0xff]  ;;  %v360_v23 = vld [vmem:[#allocation5 + $0xc8] sm:$0xff] }
  0x66   : > { %1463 = vmatpush1.bf16.msra.mxu1 %v1462_v12  ;;  %v366_v24 = vld [vmem:[#allocation5 + $0xf8] sm:$0xff]  ;;  %1401 = vmatprep.subr.bf16.mxu0 %v1400_v16  ;;  %v1466_v25 = vpack.c.bf16 %v355_v22, %v349_v20  ;;  %v368_v28 = vld [vmem:[#allocation5 + $0x108] sm:$0xff]  ;;  %v359_v29 = vld [vmem:[#allocation5 + $0xc0] sm:$0xff]  ;;  %p1769_p8 = pnand %p1768_p6, %p2050_p10 }
  0x67   : > { %1465 = vmatprep.subr.bf16.mxu1 %v1464_v17  ;;  %v1404_v26 = vpack.c.bf16 %v366_v24, %v360_v23  ;;  %v362_v27 = vld [vmem:[#allocation5 + $0xd8] sm:$0xff]  ;;  %v365_v31 = vld [vmem:[#allocation5 + $0xf0] sm:$0xff]  ;;  %v367_v33 = vld [vmem:[#allocation5 + $0x100] sm:$0xff] }
  0x68   : > { %v1468_v30 = vpack.c.bf16 %v368_v28, %v362_v27  ;;  %v361_v32 = vld [vmem:[#allocation5 + $0xd0] sm:$0xff]  ;;  %v1406_v34 = vpack.c.bf16 %v365_v31, %v359_v29  ;;  %v372_v35 = vld [vmem:[#allocation5 + $0x128] sm:$0xff]  ;;  %v378_v36 = vld [vmem:[#allocation5 + $0x158] sm:$0xff]  ;;  %p1770_p12 = pneg %p1769_p8 }
  0x69   : > { %1403 = vmatpush1.bf16.msra.mxu0 %v1402_v21  ;;  %v374_v37 = vld [vmem:[#allocation5 + $0x138] sm:$0xff]  ;;  %v1470_v38 = vpack.c.bf16 %v367_v33, %v361_v32  ;;  %v1408_v39 = vpack.c.bf16 %v378_v36, %v372_v35  ;;  %v380_v40 = vld [vmem:[#allocation5 + $0x168] sm:$0xff]  ;;  %v371_v41 = vld [vmem:[#allocation5 + $0x120] sm:$0xff] }
  0x6a   : > { %1467 = vmatpush1.bf16.msra.mxu1 %v1466_v25  ;;  %1405 = vmatprep.subr.bf16.mxu0 %v1404_v26  ;;  %v377_v42 = vld [vmem:[#allocation5 + $0x150] sm:$0xff]  ;;  %v1472_v43 = vpack.c.bf16 %v380_v40, %v374_v37  ;;  %v379_v45 = vld [vmem:[#allocation5 + $0x160] sm:$0xff]  ;;  %v384_v46 = vld [vmem:[#allocation5 + $0x188] sm:$0xff] }
  0x6b   : > { %1469 = vmatprep.subr.bf16.mxu1 %v1468_v30  ;;  %v373_v44 = vld [vmem:[#allocation5 + $0x130] sm:$0xff]  ;;  %v390_v47 = vld [vmem:[#allocation5 + $0x1b8] sm:$0xff]  ;;  %v392_v49 = vld [vmem:[#allocation5 + $0x1c8] sm:$0xff]  ;;  %v1410_v50 = vpack.c.bf16 %v377_v42, %v371_v41 }
  0x6c   : > { %v386_v48 = vld [vmem:[#allocation5 + $0x198] sm:$0xff]  ;;  %v1474_v51 = vpack.c.bf16 %v379_v45, %v373_v44  ;;  %v1412_v52 = vpack.c.bf16 %v390_v47, %v384_v46  ;;  %v383_v53 = vld [vmem:[#allocation5 + $0x180] sm:$0xff]  ;;  %v389_v54 = vld [vmem:[#allocation5 + $0x1b0] sm:$0xff] }
  0x6d   : > { %1407 = vmatpush1.bf16.msra.mxu0 %v1406_v34  ;;  %v385_v55 = vld [vmem:[#allocation5 + $0x190] sm:$0xff]  ;;  %v1476_v56 = vpack.c.bf16 %v392_v49, %v386_v48  ;;  %v391_v57 = vld [vmem:[#allocation5 + $0x1c0] sm:$0xff]  ;;  %v396_v58 = vld [vmem:[#allocation5 + $0x1e8] sm:$0xff]  ;;  %v1414_v62 = vpack.c.bf16 %v389_v54, %v383_v53 }
  0x6e   : > { %1471 = vmatpush1.bf16.msra.mxu1 %v1470_v38  ;;  %1409 = vmatprep.subr.bf16.mxu0 %v1408_v39  ;;  %v402_v59 = vld [vmem:[#allocation5 + $0x218] sm:$0xff]  ;;  %v404_v61 = vld [vmem:[#allocation5 + $0x228] sm:$0xff]  ;;  %v1478_v63 = vpack.c.bf16 %v391_v57, %v385_v55  ;;  %v395_v1 = vld [vmem:[#allocation5 + $0x1e0] sm:$0xff] }
  0x6f   : > { %1473 = vmatprep.subr.bf16.mxu1 %v1472_v43  ;;  %v398_v60 = vld [vmem:[#allocation5 + $0x1f8] sm:$0xff]  ;;  %v1416_v0 = vpack.c.bf16 %v402_v59, %v396_v58  ;;  %v401_v2 = vld [vmem:[#allocation5 + $0x210] sm:$0xff]  ;;  %v403_v5 = vld [vmem:[#allocation5 + $0x220] sm:$0xff] }
  0x70   : > { %v397_v3 = vld [vmem:[#allocation5 + $0x1f0] sm:$0xff]  ;;  %v1480_v4 = vpack.c.bf16 %v404_v61, %v398_v60  ;;  %v408_v6 = vld [vmem:[#allocation5 + $0x248] sm:$0xff]  ;;  %v414_v7 = vld [vmem:[#allocation5 + $0x278] sm:$0xff]  ;;  %v1418_v10 = vpack.c.bf16 %v401_v2, %v395_v1 }
  0x71   : > { %1411 = vmatpush1.bf16.msra.mxu0 %v1410_v50  ;;  %v410_v8 = vld [vmem:[#allocation5 + $0x258] sm:$0xff]  ;;  %v416_v9 = vld [vmem:[#allocation5 + $0x288] sm:$0xff]  ;;  %v1482_v11 = vpack.c.bf16 %v403_v5, %v397_v3  ;;  %v1420_v12 = vpack.c.bf16 %v414_v7, %v408_v6  ;;  %v407_v13 = vld [vmem:[#allocation5 + $0x240] sm:$0xff] }
  0x72   : > { %1475 = vmatpush1.bf16.msra.mxu1 %v1474_v51  ;;  %1413 = vmatprep.subr.bf16.mxu0 %v1412_v52  ;;  %v413_v14 = vld [vmem:[#allocation5 + $0x270] sm:$0xff]  ;;  %v1484_v16 = vpack.c.bf16 %v416_v9, %v410_v8  ;;  %v415_v17 = vld [vmem:[#allocation5 + $0x280] sm:$0xff]  ;;  %v420_v18 = vld [vmem:[#allocation5 + $0x2a8] sm:$0xff] }
  0x73   : > { %1477 = vmatprep.subr.bf16.mxu1 %v1476_v56  ;;  %v409_v15 = vld [vmem:[#allocation5 + $0x250] sm:$0xff]  ;;  %v426_v19 = vld [vmem:[#allocation5 + $0x2d8] sm:$0xff]  ;;  %v428_v21 = vld [vmem:[#allocation5 + $0x2e8] sm:$0xff]  ;;  %v1422_v22 = vpack.c.bf16 %v413_v14, %v407_v13 }
  0x74   : > { %v422_v20 = vld [vmem:[#allocation5 + $0x2b8] sm:$0xff]  ;;  %v1486_v23 = vpack.c.bf16 %v415_v17, %v409_v15  ;;  %v1424_v24 = vpack.c.bf16 %v426_v19, %v420_v18  ;;  %v419_v25 = vld [vmem:[#allocation5 + $0x2a0] sm:$0xff]  ;;  %v425_v26 = vld [vmem:[#allocation5 + $0x2d0] sm:$0xff] }
  0x75   : > { %1415 = vmatpush1.bf16.msra.mxu0 %v1414_v62  ;;  %v421_v27 = vld [vmem:[#allocation5 + $0x2b0] sm:$0xff]  ;;  %v1488_v28 = vpack.c.bf16 %v428_v21, %v422_v20  ;;  %v427_v29 = vld [vmem:[#allocation5 + $0x2e0] sm:$0xff]  ;;  %v432_v30 = vld [vmem:[#allocation5 + $0x308] sm:$0xff]  ;;  %v1426_v34 = vpack.c.bf16 %v425_v26, %v419_v25 }
  0x76   : > { %1479 = vmatpush1.bf16.msra.mxu1 %v1478_v63  ;;  %1417 = vmatprep.subr.bf16.mxu0 %v1416_v0  ;;  %v438_v31 = vld [vmem:[#allocation5 + $0x338] sm:$0xff]  ;;  %v440_v33 = vld [vmem:[#allocation5 + $0x348] sm:$0xff]  ;;  %v1490_v35 = vpack.c.bf16 %v427_v29, %v421_v27  ;;  %v431_v37 = vld [vmem:[#allocation5 + $0x300] sm:$0xff] }
  0x77   : > { %1481 = vmatprep.subr.bf16.mxu1 %v1480_v4  ;;  %v434_v32 = vld [vmem:[#allocation5 + $0x318] sm:$0xff]  ;;  %v1428_v36 = vpack.c.bf16 %v438_v31, %v432_v30  ;;  %v437_v38 = vld [vmem:[#allocation5 + $0x330] sm:$0xff]  ;;  %v439_v41 = vld [vmem:[#allocation5 + $0x340] sm:$0xff] }
  0x78   : > { %v433_v39 = vld [vmem:[#allocation5 + $0x310] sm:$0xff]  ;;  %v1492_v40 = vpack.c.bf16 %v440_v33, %v434_v32  ;;  %v444_v42 = vld [vmem:[#allocation5 + $0x368] sm:$0xff]  ;;  %v450_v43 = vld [vmem:[#allocation5 + $0x398] sm:$0xff]  ;;  %v1430_v46 = vpack.c.bf16 %v437_v38, %v431_v37 }
  0x79   : > { %1419 = vmatpush1.bf16.msra.mxu0 %v1418_v10  ;;  %v446_v44 = vld [vmem:[#allocation5 + $0x378] sm:$0xff]  ;;  %v452_v45 = vld [vmem:[#allocation5 + $0x3a8] sm:$0xff]  ;;  %v1494_v47 = vpack.c.bf16 %v439_v41, %v433_v39  ;;  %v1432_v48 = vpack.c.bf16 %v450_v43, %v444_v42  ;;  %v443_v49 = vld [vmem:[#allocation5 + $0x360] sm:$0xff] }
  0x7a   : > { %1483 = vmatpush1.bf16.msra.mxu1 %v1482_v11  ;;  %1421 = vmatprep.subr.bf16.mxu0 %v1420_v12  ;;  %v449_v50 = vld [vmem:[#allocation5 + $0x390] sm:$0xff]  ;;  %v1496_v52 = vpack.c.bf16 %v452_v45, %v446_v44  ;;  %v451_v53 = vld [vmem:[#allocation5 + $0x3a0] sm:$0xff]  ;;  %v456_v54 = vld [vmem:[#allocation5 + $0x3c8] sm:$0xff] }
  0x7b   : > { %1485 = vmatprep.subr.bf16.mxu1 %v1484_v16  ;;  %v445_v51 = vld [vmem:[#allocation5 + $0x370] sm:$0xff]  ;;  %v462_v55 = vld [vmem:[#allocation5 + $0x3f8] sm:$0xff]  ;;  %v464_v57 = vld [vmem:[#allocation5 + $0x408] sm:$0xff]  ;;  %v1434_v58 = vpack.c.bf16 %v449_v50, %v443_v49 }
  0x7c   : > { %v458_v56 = vld [vmem:[#allocation5 + $0x3d8] sm:$0xff]  ;;  %v1498_v59 = vpack.c.bf16 %v451_v53, %v445_v51  ;;  %v1436_v60 = vpack.c.bf16 %v462_v55, %v456_v54  ;;  %v455_v61 = vld [vmem:[#allocation5 + $0x3c0] sm:$0xff]  ;;  %v461_v62 = vld [vmem:[#allocation5 + $0x3f0] sm:$0xff] }
  0x7d   : > { %1423 = vmatpush1.bf16.msra.mxu0 %v1422_v22  ;;  %v457_v63 = vld [vmem:[#allocation5 + $0x3d0] sm:$0xff]  ;;  %v1500_v0 = vpack.c.bf16 %v464_v57, %v458_v56  ;;  %v463_v1 = vld [vmem:[#allocation5 + $0x400] sm:$0xff]  ;;  %v468_v2 = vld [vmem:[#allocation5 + $0x428] sm:$0xff]  ;;  %v1438_v6 = vpack.c.bf16 %v461_v62, %v455_v61 }
  0x7e   : > { %1487 = vmatpush1.bf16.msra.mxu1 %v1486_v23  ;;  %1425 = vmatprep.subr.bf16.mxu0 %v1424_v24  ;;  %v474_v3 = vld [vmem:[#allocation5 + $0x458] sm:$0xff]  ;;  %v476_v5 = vld [vmem:[#allocation5 + $0x468] sm:$0xff]  ;;  %v467_v7 = vld [vmem:[#allocation5 + $0x420] sm:$0xff]  ;;  %v1502_v8 = vpack.c.bf16 %v463_v1, %v457_v63 }
  0x7f   : > { %1489 = vmatprep.subr.bf16.mxu1 %v1488_v28  ;;  %v470_v4 = vld [vmem:[#allocation5 + $0x438] sm:$0xff]  ;;  %v1440_v9 = vpack.c.bf16 %v474_v3, %v468_v2  ;;  %v473_v10 = vld [vmem:[#allocation5 + $0x450] sm:$0xff]  ;;  %v475_v12 = vld [vmem:[#allocation5 + $0x460] sm:$0xff] }
  0x80   : > { %v469_v11 = vld [vmem:[#allocation5 + $0x430] sm:$0xff]  ;;  %v1504_v13 = vpack.c.bf16 %v476_v5, %v470_v4  ;;  %v480_v14 = vld [vmem:[#allocation5 + $0x488] sm:$0xff]  ;;  %v486_v15 = vld [vmem:[#allocation5 + $0x4b8] sm:$0xff]  ;;  %v1442_v19 = vpack.c.bf16 %v473_v10, %v467_v7 }
  0x81   : > { %1427 = vmatpush1.bf16.msra.mxu0 %v1426_v34  ;;  %v2124_v16 = vld [vmem:[%s2113_s14 + $0x8] sm:$0xff]  ;;  %v482_v17 = vld [vmem:[#allocation5 + $0x498] sm:$0xff]  ;;  %v1506_v20 = vpack.c.bf16 %v475_v12, %v469_v11  ;;  %v1444_v21 = vpack.c.bf16 %v486_v15, %v480_v14  ;;  %v479_v22 = vld [vmem:[#allocation5 + $0x480] sm:$0xff] }
  0x82   : > { %1491 = vmatpush1.bf16.msra.mxu1 %v1490_v35  ;;  %1429 = vmatprep.subr.bf16.mxu0 %v1428_v36  ;;  %v488_v18 = vld [vmem:[#allocation5 + $0x4c8] sm:$0xff]  ;;  %v485_v23 = vld [vmem:[#allocation5 + $0x4b0] sm:$0xff]  ;;  %v487_v26 = vld [vmem:[#allocation5 + $0x4c0] sm:$0xff] }
  0x83   : > { %1493 = vmatprep.subr.bf16.mxu1 %v1492_v40  ;;  %623 = vmatprep.mubr.f32.mxu0 %v2124_v16  ;;  %v481_v24 = vld [vmem:[#allocation5 + $0x490] sm:$0xff]  ;;  %v1508_v25 = vpack.c.bf16 %v488_v18, %v482_v17  ;;  %v492_v27 = vld [vmem:[#allocation5 + $0x4e8] sm:$0xff]  ;;  %v498_v28 = vld [vmem:[#allocation5 + $0x518] sm:$0xff]  ;;  %v1446_v31 = vpack.c.bf16 %v485_v23, %v479_v22 }
  0x84   : > { %784 = vmatprep.mubr.f32.mxu1 %v2124_v16  ;;  %v494_v29 = vld [vmem:[#allocation5 + $0x4f8] sm:$0xff]  ;;  %v500_v30 = vld [vmem:[#allocation5 + $0x528] sm:$0xff]  ;;  %v1510_v32 = vpack.c.bf16 %v487_v26, %v481_v24  ;;  %v1448_v33 = vpack.c.bf16 %v498_v28, %v492_v27  ;;  %v491_v34 = vld [vmem:[#allocation5 + $0x4e0] sm:$0xff] }
  0x85   : > { %1431 = vmatpush1.bf16.msra.mxu0 %v1430_v46  ;;  %v497_v35 = vld [vmem:[#allocation5 + $0x510] sm:$0xff]  ;;  %v1512_v37 = vpack.c.bf16 %v500_v30, %v494_v29  ;;  %v499_v38 = vld [vmem:[#allocation5 + $0x520] sm:$0xff]  ;;  %v504_v39 = vld [vmem:[#allocation5 + $0x548] sm:$0xff] }
  0x86   : > { %1495 = vmatpush1.bf16.msra.mxu1 %v1494_v47  ;;  %1433 = vmatprep.subr.bf16.mxu0 %v1432_v48  ;;  %v493_v36 = vld [vmem:[#allocation5 + $0x4f0] sm:$0xff]  ;;  %v510_v40 = vld [vmem:[#allocation5 + $0x578] sm:$0xff]  ;;  %v512_v42 = vld [vmem:[#allocation5 + $0x588] sm:$0xff]  ;;  %v1450_v43 = vpack.c.bf16 %v497_v35, %v491_v34 }
  0x87   : > { %1497 = vmatprep.subr.bf16.mxu1 %v1496_v52  ;;  %v506_v41 = vld [vmem:[#allocation5 + $0x558] sm:$0xff]  ;;  %v1514_v44 = vpack.c.bf16 %v499_v38, %v493_v36  ;;  %v1452_v45 = vpack.c.bf16 %v510_v40, %v504_v39  ;;  %v503_v46 = vld [vmem:[#allocation5 + $0x540] sm:$0xff]  ;;  %v509_v47 = vld [vmem:[#allocation5 + $0x570] sm:$0xff] }
  0x88   : > { %v505_v48 = vld [vmem:[#allocation5 + $0x550] sm:$0xff]  ;;  %v1516_v49 = vpack.c.bf16 %v512_v42, %v506_v41  ;;  %v511_v50 = vld [vmem:[#allocation5 + $0x580] sm:$0xff]  ;;  %v516_v51 = vld [vmem:[#allocation5 + $0x5a8] sm:$0xff]  ;;  %v1454_v55 = vpack.c.bf16 %v509_v47, %v503_v46 }
  0x89   : > { %1435 = vmatpush1.bf16.msra.mxu0 %v1434_v58  ;;  %v522_v52 = vld [vmem:[#allocation5 + $0x5d8] sm:$0xff]  ;;  %v524_v54 = vld [vmem:[#allocation5 + $0x5e8] sm:$0xff]  ;;  %v1518_v56 = vpack.c.bf16 %v511_v50, %v505_v48  ;;  %v515_v58 = vld [vmem:[#allocation5 + $0x5a0] sm:$0xff] }
  0x8a   : > { %1499 = vmatpush1.bf16.msra.mxu1 %v1498_v59  ;;  %1437 = vmatprep.subr.bf16.mxu0 %v1436_v60  ;;  %v518_v53 = vld [vmem:[#allocation5 + $0x5b8] sm:$0xff]  ;;  %v1456_v57 = vpack.c.bf16 %v522_v52, %v516_v51  ;;  %v521_v59 = vld [vmem:[#allocation5 + $0x5d0] sm:$0xff]  ;;  %v523_v62 = vld [vmem:[#allocation5 + $0x5e0] sm:$0xff] }
  0x8b   : > { %1501 = vmatprep.subr.bf16.mxu1 %v1500_v0  ;;  %v517_v60 = vld [vmem:[#allocation5 + $0x5b0] sm:$0xff]  ;;  %v1520_v61 = vpack.c.bf16 %v524_v54, %v518_v53  ;;  %v340_v63 = vld [vmem:[#allocation5 + $0x28] sm:$0xff]  ;;  %v346_v0 = vld [vmem:[#allocation5 + $0x58] sm:$0xff]  ;;  %v1458_v1 = vpack.c.bf16 %v521_v59, %v515_v58 }
  0x8c   : > { %v1522_v2 = vpack.c.bf16 %v523_v62, %v517_v60  ;;  %v1524_v3 = vpack.c.bf16 %v346_v0, %v340_v63  ;;  %v339_v4 = vld [vmem:[#allocation5 + $0x20] sm:$0xff]  ;;  %v345_v5 = vld [vmem:[#allocation5 + $0x50] sm:$0xff]  ;;  %v358_v7 = vld [vmem:[#allocation5 + $0xb8] sm:$0xff] }
  0x8d   : > { %1439 = vmatpush1.bf16.msra.mxu0 %v1438_v6  ;;  %v352_v6 = vld [vmem:[#allocation5 + $0x88] sm:$0xff]  ;;  %v351_v10 = vld [vmem:[#allocation5 + $0x80] sm:$0xff]  ;;  %v357_v11 = vld [vmem:[#allocation5 + $0xb0] sm:$0xff] }
  0x8e   : > { %1503 = vmatpush1.bf16.msra.mxu1 %v1502_v8  ;;  %1441 = vmatprep.subr.bf16.mxu0 %v1440_v9  ;;  %v2129_v8 = vld [vmem:[%s2113_s14] sm:$0xff]  ;;  %v1526_v9 = vpack.c.bf16 %v345_v5, %v339_v4  ;;  %v2132_v12 = vld [vmem:[%s2113_s14 + $0x18] sm:$0xff]  ;;  %v364_v14 = vld [vmem:[#allocation5 + $0xe8] sm:$0xff]  ;;  %v1530_v18 = vpack.c.bf16 %v357_v11, %v351_v10 }
  0x8f   : > { %1505 = vmatprep.subr.bf16.mxu1 %v1504_v13  ;;  %v1528_v13 = vpack.c.bf16 %v358_v7, %v352_v6  ;;  %v370_v15 = vld [vmem:[#allocation5 + $0x118] sm:$0xff]  ;;  %v2137_v17 = vld [vmem:[%s2113_s14 + $0x10] sm:$0xff]  ;;  %v376_v23 = vld [vmem:[#allocation5 + $0x148] sm:$0xff] }
  0x90   : > { %v1532_v22 = vpack.c.bf16 %v370_v15, %v364_v14  ;;  %v382_v24 = vld [vmem:[#allocation5 + $0x178] sm:$0xff]  ;;  %v375_v27 = vld [vmem:[#allocation5 + $0x140] sm:$0xff]  ;;  %v381_v28 = vld [vmem:[#allocation5 + $0x170] sm:$0xff] }
  0x91   : > { %1443 = vmatpush1.bf16.msra.mxu0 %v1442_v19  ;;  %v363_v19 = vld [vmem:[#allocation5 + $0xe0] sm:$0xff]  ;;  %v2152_v29 = vld [vmem:[%s2113_s14 + $0x38] sm:$0xff]  ;;  %v1536_v30 = vpack.c.bf16 %v382_v24, %v376_v23  ;;  %v1538_v34 = vpack.c.bf16 %v381_v28, %v375_v27  ;;  %v393_v36 = vld [vmem:[#allocation5 + $0x1d0] sm:$0xff] }
  0x92   : > { %1507 = vmatpush1.bf16.msra.mxu1 %v1506_v20  ;;  %1445 = vmatprep.subr.bf16.mxu0 %v1444_v21  ;;  %v369_v20 = vld [vmem:[#allocation5 + $0x110] sm:$0xff]  ;;  %v2142_v21 = vld [vmem:[%s2113_s14 + $0x28] sm:$0xff]  ;;  %v387_v35 = vld [vmem:[#allocation5 + $0x1a0] sm:$0xff] }
  0x93   : > { %1509 = vmatprep.subr.bf16.mxu1 %v1508_v25  ;;  %v2147_v25 = vld [vmem:[%s2113_s14 + $0x20] sm:$0xff]  ;;  %v1534_v26 = vpack.c.bf16 %v369_v20, %v363_v19  ;;  %v400_v39 = vld [vmem:[#allocation5 + $0x208] sm:$0xff]  ;;  %v406_v40 = vld [vmem:[#allocation5 + $0x238] sm:$0xff]  ;;  %v1542_v42 = vpack.c.bf16 %v393_v36, %v387_v35 }
  0x94   : > { %v2167_v41 = vld [vmem:[%s2113_s14 + $0x40] sm:$0xff]  ;;  %v1544_v46 = vpack.c.bf16 %v406_v40, %v400_v39  ;;  %v412_v47 = vld [vmem:[#allocation5 + $0x268] sm:$0xff]  ;;  %v418_v48 = vld [vmem:[#allocation5 + $0x298] sm:$0xff] }
  0x95   : > { %1447 = vmatpush1.bf16.msra.mxu0 %v1446_v31  ;;  %v388_v31 = vld [vmem:[#allocation5 + $0x1a8] sm:$0xff]  ;;  %v411_v51 = vld [vmem:[#allocation5 + $0x260] sm:$0xff]  ;;  %v417_v52 = vld [vmem:[#allocation5 + $0x290] sm:$0xff]  ;;  %v1548_v54 = vpack.c.bf16 %v418_v48, %v412_v47 }
  0x96   : > { %1511 = vmatpush1.bf16.msra.mxu1 %v1510_v32  ;;  %1449 = vmatprep.subr.bf16.mxu0 %v1448_v33  ;;  %v394_v32 = vld [vmem:[#allocation5 + $0x1d8] sm:$0xff]  ;;  %v2157_v33 = vld [vmem:[%s2113_s14 + $0x30] sm:$0xff]  ;;  %v2182_v53 = vld [vmem:[%s2113_s14 + $0x68] sm:$0xff]  ;;  %v1550_v58 = vpack.c.bf16 %v417_v52, %v411_v51 }
  0x97   : > { %1513 = vmatprep.subr.bf16.mxu1 %v1512_v37  ;;  %v2162_v37 = vld [vmem:[%s2113_s14 + $0x48] sm:$0xff]  ;;  %v1540_v38 = vpack.c.bf16 %v394_v32, %v388_v31  ;;  %v423_v59 = vld [vmem:[#allocation5 + $0x2c0] sm:$0xff]  ;;  %v429_v60 = vld [vmem:[#allocation5 + $0x2f0] sm:$0xff] }
  0x98   : > { %v436_v63 = vld [vmem:[#allocation5 + $0x328] sm:$0xff]  ;;  %v442_v0 = vld [vmem:[#allocation5 + $0x358] sm:$0xff]  ;;  %v441_v4 = vld [vmem:[#allocation5 + $0x350] sm:$0xff] }
  0x99   : > { %1451 = vmatpush1.bf16.msra.mxu0 %v1450_v43  ;;  %v399_v43 = vld [vmem:[#allocation5 + $0x200] sm:$0xff]  ;;  %v2202_v5 = vld [vmem:[%s2113_s14 + $0x88] sm:$0xff]  ;;  %v1556_v6 = vpack.c.bf16 %v442_v0, %v436_v63  ;;  %v453_v14 = vld [vmem:[#allocation5 + $0x3b0] sm:$0xff] }
  0x9a   : > { %1515 = vmatpush1.bf16.msra.mxu1 %v1514_v44  ;;  %1453 = vmatprep.subr.bf16.mxu0 %v1452_v45  ;;  %v405_v44 = vld [vmem:[#allocation5 + $0x230] sm:$0xff]  ;;  %v2172_v45 = vld [vmem:[%s2113_s14 + $0x58] sm:$0xff]  ;;  %v448_v7 = vld [vmem:[#allocation5 + $0x388] sm:$0xff] }
  0x9b   : > { %1517 = vmatprep.subr.bf16.mxu1 %v1516_v49  ;;  %v2177_v49 = vld [vmem:[%s2113_s14 + $0x50] sm:$0xff]  ;;  %v1546_v50 = vpack.c.bf16 %v405_v44, %v399_v43  ;;  %v2207_v10 = vld [vmem:[%s2113_s14 + $0x80] sm:$0xff]  ;;  %v2212_v15 = vld [vmem:[%s2113_s14 + $0x98] sm:$0xff] }
  0x9c   : > { %v460_v19 = vld [vmem:[#allocation5 + $0x3e8] sm:$0xff]  ;;  %v466_v20 = vld [vmem:[#allocation5 + $0x418] sm:$0xff]  ;;  %v459_v24 = vld [vmem:[#allocation5 + $0x3e0] sm:$0xff] }
  0x9d   : > { %1455 = vmatpush1.bf16.msra.mxu0 %v1454_v55  ;;  %v424_v55 = vld [vmem:[#allocation5 + $0x2c8] sm:$0xff]  ;;  %v1564_v28 = vpack.c.bf16 %v466_v20, %v460_v19  ;;  %v478_v31 = vld [vmem:[#allocation5 + $0x478] sm:$0xff]  ;;  %v2227_v32 = vld [vmem:[%s2113_s14 + $0xa0] sm:$0xff] }
  0x9e   : > { %1519 = vmatpush1.bf16.msra.mxu1 %v1518_v56  ;;  %1457 = vmatprep.subr.bf16.mxu0 %v1456_v57  ;;  %v430_v56 = vld [vmem:[#allocation5 + $0x2f8] sm:$0xff]  ;;  %v2187_v57 = vld [vmem:[%s2113_s14 + $0x60] sm:$0xff]  ;;  %v2222_v27 = vld [vmem:[%s2113_s14 + $0xa8] sm:$0xff] }
  0x9f   : > { %1521 = vmatprep.subr.bf16.mxu1 %v1520_v61  ;;  %v2192_v61 = vld [vmem:[%s2113_s14 + $0x78] sm:$0xff]  ;;  %v1552_v62 = vpack.c.bf16 %v430_v56, %v424_v55  ;;  %v471_v35 = vld [vmem:[#allocation5 + $0x440] sm:$0xff]  ;;  %v477_v36 = vld [vmem:[#allocation5 + $0x470] sm:$0xff] }
  0xa0   : > { %v484_v40 = vld [vmem:[#allocation5 + $0x4a8] sm:$0xff]  ;;  %v2237_v43 = vld [vmem:[%s2113_s14 + $0xb0] sm:$0xff]  ;;  %v1570_v44 = vpack.c.bf16 %v477_v36, %v471_v35  ;;  %v502_v52 = vld [vmem:[#allocation5 + $0x538] sm:$0xff] }
  0xa1   : > { %1459 = vmatpush1.bf16.msra.mxu0 %v1458_v1  ;;  %v2197_v1 = vld [vmem:[%s2113_s14 + $0x70] sm:$0xff]  ;;  %v2242_v48 = vld [vmem:[%s2113_s14 + $0xc8] sm:$0xff]  ;;  %v495_v56 = vld [vmem:[#allocation5 + $0x500] sm:$0xff] }
  0xa2   : > { %1523 = vmatpush1.bf16.msra.mxu1 %v1522_v2  ;;  %1525 = vmatprep.subr.bf16.mxu0 %v1524_v3  ;;  %v1554_v2 = vpack.c.bf16 %v429_v60, %v423_v59  ;;  %v489_v47 = vld [vmem:[#allocation5 + $0x4d0] sm:$0xff]  ;;  %v496_v51 = vld [vmem:[#allocation5 + $0x508] sm:$0xff]  ;;  %v2252_v59 = vld [vmem:[%s2113_s14 + $0xd8] sm:$0xff] }
  0xa3   : > { %1588 = vmatprep.subr.bf16.mxu1 %v1524_v3  ;;  %v435_v3 = vld [vmem:[#allocation5 + $0x320] sm:$0xff]  ;;  %v1576_v60 = vpack.c.bf16 %v502_v52, %v496_v51  ;;  %v514_v63 = vld [vmem:[#allocation5 + $0x598] sm:$0xff]  ;;  %v2257_v0 = vld [vmem:[%s2113_s14 + $0xd0] sm:$0xff] }
  0xa4   : > { %624 = vmatmul.mubr.f32.vlgmr.msra.gmra.mrb[0].mxu0 %v2129_v8  ;;  %v1558_v11 = vpack.c.bf16 %v441_v4, %v435_v3  ;;  %v507_v3 = vld [vmem:[#allocation5 + $0x560] sm:$0xff]  ;;  %v513_v4 = vld [vmem:[#allocation5 + $0x590] sm:$0xff]  ;;  %v334_v20 = vld [vmem:[%s2113_s14 + $0xf8] sm:$0xff] }
  0xa5   : > { %785 = vmatmul.mubr.f32.vlgmr.msra.gmra.mrb[0].mxu1 %v2129_v8  ;;  %1527 = vmatpush1.bf16.msra.mxu0 %v1526_v9  ;;  %v525_v19 = vld [vmem:[#allocation5 + $0x5f0] sm:$0xff] }
  0xa6   : > { %1604 = vmatpush1.bf16.msra.mxu1 %v1526_v9  ;;  %629 = vmatprep.mubr.f32.mxu0 %v2132_v12  ;;  %v454_v9 = vld [vmem:[#allocation5 + $0x3b8] sm:$0xff] }
  0xa7   : > { %790 = vmatprep.mubr.f32.mxu1 %v2132_v12  ;;  %1529 = vmatprep.subr.bf16.mxu0 %v1528_v13 }
  0xa8   : > { %630 = vmatmul.mubr.f32.gmra.mrb[2].mxu0 %v2137_v17  ;;  %1589 = vmatprep.subr.bf16.mxu1 %v1528_v13  ;;  %v447_v13 = vld [vmem:[#allocation5 + $0x380] sm:$0xff] }
  0xa9   : > { %791 = vmatmul.mubr.f32.gmra.mrb[2].mxu1 %v2137_v17  ;;  %1531 = vmatpush1.bf16.msra.mxu0 %v1530_v18  ;;  %v1562_v23 = vpack.c.bf16 %v453_v14, %v447_v13  ;;  %v331_v13 = vld [vmem:[%s2113_s14 + $0xe0] sm:$0xff]  ;;  %v1582_v14 = vpack.c.bf16 %v513_v4, %v507_v3 }
  0xaa   : > { %1605 = vmatpush1.bf16.msra.mxu1 %v1530_v18  ;;  %635 = vmatprep.mubr.f32.mxu0 %v2142_v21  ;;  %v1560_v18 = vpack.c.bf16 %v454_v9, %v448_v7  ;;  %v520_v9 = vld [vmem:[#allocation5 + $0x5c8] sm:$0xff] }
  0xab   : > { %796 = vmatprep.mubr.f32.mxu1 %v2142_v21  ;;  %1533 = vmatprep.subr.bf16.mxu0 %v1532_v22 }
  0xac   : > { %636 = vmatmul.mubr.f32.gmra.mrb[4].mxu0 %v2147_v25  ;;  %1590 = vmatprep.subr.bf16.mxu1 %v1532_v22  ;;  %v2217_v22 = vld [vmem:[%s2113_s14 + $0x90] sm:$0xff] }
  0xad   : > { %797 = vmatmul.mubr.f32.gmra.mrb[4].mxu1 %v2147_v25  ;;  %1535 = vmatpush1.bf16.msra.mxu0 %v1534_v26 }
  0xae   : > { %1606 = vmatpush1.bf16.msra.mxu1 %v1534_v26  ;;  %641 = vmatprep.mubr.f32.mxu0 %v2152_v29  ;;  %v465_v26 = vld [vmem:[#allocation5 + $0x410] sm:$0xff] }
  0xaf   : > { %802 = vmatprep.mubr.f32.mxu1 %v2152_v29  ;;  %1537 = vmatprep.subr.bf16.mxu0 %v1536_v30 }
  0xb0   : > { %642 = vmatmul.mubr.f32.gmra.mrb[6].mxu0 %v2157_v33  ;;  %1591 = vmatprep.subr.bf16.mxu1 %v1536_v30  ;;  %v472_v30 = vld [vmem:[#allocation5 + $0x448] sm:$0xff] }
  0xb1   : > { %803 = vmatmul.mubr.f32.gmra.mrb[6].mxu1 %v2157_v33  ;;  %1539 = vmatpush1.bf16.msra.mxu0 %v1538_v34  ;;  %v1568_v39 = vpack.c.bf16 %v478_v31, %v472_v30 }
  0xb2   : > { %1607 = vmatpush1.bf16.msra.mxu1 %v1538_v34  ;;  %647 = vmatprep.mubr.f32.mxu0 %v2162_v37  ;;  %v1566_v34 = vpack.c.bf16 %v465_v26, %v459_v24  ;;  %v333_v24 = vld [vmem:[%s2113_s14 + $0xf0] sm:$0xff] }
  0xb3   : > { %808 = vmatprep.mubr.f32.mxu1 %v2162_v37  ;;  %1541 = vmatprep.subr.bf16.mxu0 %v1540_v38 }
  0xb4   : > { %648 = vmatmul.mubr.f32.gmra.mrb[8].mxu0 %v2167_v41  ;;  %1592 = vmatprep.subr.bf16.mxu1 %v1540_v38  ;;  %v2232_v38 = vld [vmem:[%s2113_s14 + $0xb8] sm:$0xff] }
  0xb5   : > { %809 = vmatmul.mubr.f32.gmra.mrb[8].mxu1 %v2167_v41  ;;  %1543 = vmatpush1.bf16.msra.mxu0 %v1542_v42 }
  0xb6   : > { %1608 = vmatpush1.bf16.msra.mxu1 %v1542_v42  ;;  %653 = vmatprep.mubr.f32.mxu0 %v2172_v45  ;;  %v490_v42 = vld [vmem:[#allocation5 + $0x4d8] sm:$0xff] }
  0xb7   : > { %814 = vmatprep.mubr.f32.mxu1 %v2172_v45  ;;  %1545 = vmatprep.subr.bf16.mxu0 %v1544_v46 }
  0xb8   : > { %654 = vmatmul.mubr.f32.gmra.mrb[10].mxu0 %v2177_v49  ;;  %1593 = vmatprep.subr.bf16.mxu1 %v1544_v46  ;;  %v483_v46 = vld [vmem:[#allocation5 + $0x4a0] sm:$0xff] }
  0xb9   : > { %815 = vmatmul.mubr.f32.gmra.mrb[10].mxu1 %v2177_v49  ;;  %1547 = vmatpush1.bf16.msra.mxu0 %v1546_v50  ;;  %v1574_v55 = vpack.c.bf16 %v489_v47, %v483_v46 }
  0xba   : > { %1609 = vmatpush1.bf16.msra.mxu1 %v1546_v50  ;;  %659 = vmatprep.mubr.f32.mxu0 %v2182_v53  ;;  %v1572_v50 = vpack.c.bf16 %v490_v42, %v484_v40 }
  0xbb   : > { %820 = vmatprep.mubr.f32.mxu1 %v2182_v53  ;;  %1549 = vmatprep.subr.bf16.mxu0 %v1548_v54 }
  0xbc   : > { %660 = vmatmul.mubr.f32.gmra.mrb[12].mxu0 %v2187_v57  ;;  %1594 = vmatprep.subr.bf16.mxu1 %v1548_v54  ;;  %v2247_v54 = vld [vmem:[%s2113_s14 + $0xc0] sm:$0xff] }
  0xbd   : > { %821 = vmatmul.mubr.f32.gmra.mrb[12].mxu1 %v2187_v57  ;;  %1551 = vmatpush1.bf16.msra.mxu0 %v1550_v58 }
  0xbe   : > { %1610 = vmatpush1.bf16.msra.mxu1 %v1550_v58  ;;  %665 = vmatprep.mubr.f32.mxu0 %v2192_v61  ;;  %v501_v58 = vld [vmem:[#allocation5 + $0x530] sm:$0xff] }
  0xbf   : > { %826 = vmatprep.mubr.f32.mxu1 %v2192_v61  ;;  %1553 = vmatprep.subr.bf16.mxu0 %v1552_v62 }
  0xc0   : > { %666 = vmatmul.mubr.f32.gmra.mrb[14].mxu0 %v2197_v1  ;;  %1595 = vmatprep.subr.bf16.mxu1 %v1552_v62  ;;  %v508_v62 = vld [vmem:[#allocation5 + $0x568] sm:$0xff] }
  0xc1   : > { %827 = vmatmul.mubr.f32.gmra.mrb[14].mxu1 %v2197_v1  ;;  %1555 = vmatpush1.bf16.msra.mxu0 %v1554_v2  ;;  %v1580_v7 = vpack.c.bf16 %v514_v63, %v508_v62 }
  0xc2   : > { %1611 = vmatpush1.bf16.msra.mxu1 %v1554_v2  ;;  %671 = vmatprep.mubr.f32.mxu0 %v2202_v5  ;;  %v1578_v2 = vpack.c.bf16 %v501_v58, %v495_v56 }
  0xc3   : > { %832 = vmatprep.mubr.f32.mxu1 %v2202_v5  ;;  %1557 = vmatprep.subr.bf16.mxu0 %v1556_v6 }
  0xc4   : > { %672 = vmatmul.mubr.f32.gmra.mrb[16].mxu0 %v2207_v10  ;;  %1596 = vmatprep.subr.bf16.mxu1 %v1556_v6  ;;  %v332_v6 = vld [vmem:[%s2113_s14 + $0xe8] sm:$0xff]  ;;  %s1921_s14 = smov [#allocation7]  }
  0xc5   : > { %833 = vmatmul.mubr.f32.gmra.mrb[16].mxu1 %v2207_v10  ;;  %1559 = vmatpush1.bf16.msra.mxu0 %v1558_v11  ;;  %s1771_s26 = sshll.u32 %s1921_s14, 4  ;;  %s1772_s26 = int_to_ptr.vmem [resolvable:$false] %s1771_s26 }
  0xc6   : > { %1612 = vmatpush1.bf16.msra.mxu1 %v1558_v11  ;;  %677 = vmatprep.mubr.f32.mxu0 %v2212_v15  ;;  %v526_v11 = vld [vmem:[#allocation5 + $0x5f8] sm:$0xff]  ;;  %s1773_s25 = scalar_lea.vmem %s1772_s26, 8192  ;;  %p1774_p11 = scmp.lt.s32.totalorder %s2467_s16, %s1772_s26 }
  0xc7   : > { %838 = vmatprep.mubr.f32.mxu1 %v2212_v15  ;;  %1561 = vmatprep.subr.bf16.mxu0 %v1560_v18  ;;  %p1775_p0 = scmp.lt.s32.totalorder %s1773_s25, %s1767_s10 }
  0xc8   : > { %678 = vmatmul.mubr.f32.gmra.mrb[18].mxu0 %v2217_v22  ;;  %1597 = vmatprep.subr.bf16.mxu1 %v1560_v18  ;;  %v519_v18 = vld [vmem:[#allocation5 + $0x5c0] sm:$0xff] }
  0xc9   : > { %839 = vmatmul.mubr.f32.gmra.mrb[18].mxu1 %v2217_v22  ;;  %1563 = vmatpush1.bf16.msra.mxu0 %v1562_v23  ;;  %v1586_v26 = vpack.c.bf16 %v525_v19, %v519_v18  ;;  %p1776_p5 = por %p1775_p0, %p1774_p11 }
  0xca   : > { %1613 = vmatpush1.bf16.msra.mxu1 %v1562_v23  ;;  %683 = vmatprep.mubr.f32.mxu0 %v2222_v27  ;;  %v1584_v23 = vpack.c.bf16 %v526_v11, %v520_v9 }
  0xcb   : > { %844 = vmatprep.mubr.f32.mxu1 %v2222_v27  ;;  %1565 = vmatprep.subr.bf16.mxu0 %v1564_v28  ;;  %p1777_p9 = pnand %p1776_p5, %p1770_p12 }
  0xcc   : > { %684 = vmatmul.mubr.f32.gmra.mrb[20].mxu0 %v2227_v32  ;;  %1598 = vmatprep.subr.bf16.mxu1 %v1564_v28 }
  0xcd   : > { %845 = vmatmul.mubr.f32.gmra.mrb[20].mxu1 %v2227_v32  ;;  %1567 = vmatpush1.bf16.msra.mxu0 %v1566_v34 }
  0xce   : > { %1614 = vmatpush1.bf16.msra.mxu1 %v1566_v34  ;;  %689 = vmatprep.mubr.f32.mxu0 %v2232_v38 }
  0xcf   : > { %850 = vmatprep.mubr.f32.mxu1 %v2232_v38  ;;  %1569 = vmatprep.subr.bf16.mxu0 %v1568_v39 }
  0xd0   : > { %690 = vmatmul.mubr.f32.gmra.mrb[22].mxu0 %v2237_v43  ;;  %1599 = vmatprep.subr.bf16.mxu1 %v1568_v39 }
  0xd1   : > { %851 = vmatmul.mubr.f32.gmra.mrb[22].mxu1 %v2237_v43  ;;  %1571 = vmatpush1.bf16.msra.mxu0 %v1570_v44 }
  0xd2   : > { %1615 = vmatpush1.bf16.msra.mxu1 %v1570_v44  ;;  %695 = vmatprep.mubr.f32.mxu0 %v2242_v48 }
  0xd3   : > { %856 = vmatprep.mubr.f32.mxu1 %v2242_v48  ;;  %1573 = vmatprep.subr.bf16.mxu0 %v1572_v50 }
  0xd4   : > { %696 = vmatmul.mubr.f32.gmra.mrb[24].mxu0 %v2247_v54  ;;  %1600 = vmatprep.subr.bf16.mxu1 %v1572_v50 }
  0xd5   : > { %857 = vmatmul.mubr.f32.gmra.mrb[24].mxu1 %v2247_v54  ;;  %1575 = vmatpush1.bf16.msra.mxu0 %v1574_v55 }
  0xd6   : > { %1616 = vmatpush1.bf16.msra.mxu1 %v1574_v55  ;;  %701 = vmatprep.mubr.f32.mxu0 %v2252_v59 }
  0xd7   : > { %862 = vmatprep.mubr.f32.mxu1 %v2252_v59  ;;  %1577 = vmatprep.subr.bf16.mxu0 %v1576_v60 }
  0xd8   : > { %702 = vmatmul.mubr.f32.gmra.mrb[26].mxu0 %v2257_v0  ;;  %1601 = vmatprep.subr.bf16.mxu1 %v1576_v60 }
  0xd9   : > { %863 = vmatmul.mubr.f32.gmra.mrb[26].mxu1 %v2257_v0  ;;  %1579 = vmatpush1.bf16.msra.mxu0 %v1578_v2 }
  0xda   : > { %1617 = vmatpush1.bf16.msra.mxu1 %v1578_v2  ;;  %707 = vmatprep.mubr.f32.mxu0 %v332_v6 }
  0xdb   : > { %868 = vmatprep.mubr.f32.mxu1 %v332_v6  ;;  %1581 = vmatprep.subr.bf16.mxu0 %v1580_v7 }
  0xdc   : > { %708 = vmatmul.mubr.f32.gmra.mrb[28].mxu0 %v331_v13  ;;  %1602 = vmatprep.subr.bf16.mxu1 %v1580_v7 }
  0xdd   : > { %869 = vmatmul.mubr.f32.gmra.mrb[28].mxu1 %v331_v13  ;;  %1583 = vmatpush1.bf16.msra.mxu0 %v1582_v14 }
  0xde   : > { %1618 = vmatpush1.bf16.msra.mxu1 %v1582_v14  ;;  %713 = vmatprep.mubr.f32.mxu0 %v334_v20 }
  0xdf   : > { %874 = vmatprep.mubr.f32.mxu1 %v334_v20  ;;  %1585 = vmatprep.subr.bf16.mxu0 %v1584_v23 }
  0xe0   : > { %714 = vmatmul.mubr.f32.gmra.mrb[30].mxu0 %v333_v24  ;;  %1603 = vmatprep.subr.bf16.mxu1 %v1584_v23 }
  0xe1   : > { %875 = vmatmul.mubr.f32.gmra.mrb[30].mxu1 %v333_v24  ;;  %1587 = vmatpush1.bf16.msra.mxu0 %v1586_v26 }
  0xe2   : > { %1619 = vmatpush1.bf16.msra.mxu1 %v1586_v26  ;;  %945 = vmatprep.mubr.f32.mxu0 %v2124_v16  ;;  %v529_v16 = vlaneseq }
  0xe3   : > { %993 = vmatprep.mubr.f32.mxu1 %v2202_v5 }
  0xe4   : > { %946 = vmatmul.mubr.f32.vlgmr.msra.gmra.mrb[32].mxu0 %v2129_v8  ;;  %v2295_v8 = vshrl.u32 %v529_v16, 7 }
  0xe5   : > { %994 = vmatmul.mubr.f32.vlgmr.msra.gmra.mrb[32].mxu1 %v2207_v10  ;;  %951 = vmatprep.mubr.f32.mxu0 %v2132_v12 }
  0xe6   : > { %999 = vmatprep.mubr.f32.mxu1 %v2212_v15  ;;  %v531_v12 = vsub.s32 0, %v2295_v8 }
  0xe8   : > { %952 = vmatmul.mubr.f32.gmra.mrb[34].mxu0 %v2137_v17  ;;  %v2301_v17 = vld [vmem:[%s2666_s2] sm:$0x3f] }
  0xe9   : > { %1000 = vmatmul.mubr.f32.gmra.mrb[34].mxu1 %v2217_v22  ;;  %957 = vmatprep.mubr.f32.mxu0 %v2142_v21  ;;  %v539_v21 = vsub.s32 2, %v2295_v8 }
  0xea   : > { %1005 = vmatprep.mubr.f32.mxu1 %v2222_v27 }
  0xec   : > { %958 = vmatmul.mubr.f32.gmra.mrb[36].mxu0 %v2147_v25  ;;  %v535_v25 = vsub.s32 1, %v2295_v8 }
  0xed   : > { %1006 = vmatmul.mubr.f32.gmra.mrb[36].mxu1 %v2227_v32  ;;  %963 = vmatprep.mubr.f32.mxu0 %v2152_v29  ;;  %v543_v29 = vsub.s32 3, %v2295_v8 }
  0xee   : > { %1011 = vmatprep.mubr.f32.mxu1 %v2232_v38 }
  0xf0   : > { %964 = vmatmul.mubr.f32.gmra.mrb[38].mxu0 %v2157_v33  ;;  %v2307_v33 = vrot.slane %v2301_v17, %v531_v12 }
  0xf1   : > { %1012 = vmatmul.mubr.f32.gmra.mrb[38].mxu1 %v2237_v43  ;;  %969 = vmatprep.mubr.f32.mxu0 %v2162_v37  ;;  %v2310_v37 = vrot.slane %v2301_v17, %v539_v21 }
  0xf2   : > { %1017 = vmatprep.mubr.f32.mxu1 %v2242_v48 }
  0xf4   : > { %970 = vmatmul.mubr.f32.gmra.mrb[40].mxu0 %v2167_v41  ;;  %v2313_v41 = vrot.slane %v2301_v17, %v535_v25 }
  0xf5   : > { %1018 = vmatmul.mubr.f32.gmra.mrb[40].mxu1 %v2247_v54  ;;  %975 = vmatprep.mubr.f32.mxu0 %v2172_v45  ;;  %v2316_v45 = vrot.slane %v2301_v17, %v543_v29 }
  0xf6   : > { %1023 = vmatprep.mubr.f32.mxu1 %v2252_v59 }
  0xf8   : > { %976 = vmatmul.mubr.f32.gmra.mrb[42].mxu0 %v2177_v49 }
  0xf9   : > { %1024 = vmatmul.mubr.f32.gmra.mrb[42].mxu1 %v2257_v0  ;;  %981 = vmatprep.mubr.f32.mxu0 %v2182_v53 }
  0xfa   : > { %1029 = vmatprep.mubr.f32.mxu1 %v332_v6 }
  0xfc   : > { %982 = vmatmul.mubr.f32.gmra.mrb[44].mxu0 %v2187_v57 }
  0xfd   : > { %1030 = vmatmul.mubr.f32.gmra.mrb[44].mxu1 %v331_v13  ;;  %987 = vmatprep.mubr.f32.mxu0 %v2192_v61 }
  0xfe   : > { %1035 = vmatprep.mubr.f32.mxu1 %v334_v20 }
 0x100   : > { %988 = vmatmul.mubr.f32.gmra.mrb[46].mxu0 %v2197_v1 }
 0x101   : > { %1036 = vmatmul.mubr.f32.gmra.mrb[46].mxu1 %v333_v24 }
 0x177   : > { %v625_v49 = vpop.f32.mrb[0].mxu0 }
 0x178   : > { %v626_v53 = vadd.f32 %v625_v49, %v2307_v33  ;;  %v786_v57 = vpop.f32.mrb[0].mxu1  ;;  %v627_v61 = vpop.f32.mrb[1].mxu0 }
 0x179   : > { %v787_v1 = vadd.f32 %v786_v57, %v2310_v37  ;;  %v628_v5 = vadd.f32 %v627_v61, %v2313_v41  ;;  %v788_v10 = vpop.f32.mrb[1].mxu1 }
 0x17a   : > { %1042 = vst [vmem:[%s2322_s17] sm:$0xff] %v626_v53  ;;  %v789_v15 = vadd.f32 %v788_v10, %v2316_v45 }
 0x17b   : > { %1074 = vst [vmem:[%s2327_s8] sm:$0xff] %v787_v1  ;;  %1043 = vst [vmem:[%s2322_s17 + $0x8] sm:$0xff] %v628_v5  ;;  %v631_v22 = vpop.f32.mrb[2].mxu0 }
 0x17c   : > { %1075 = vst [vmem:[%s2327_s8 + $0x8] sm:$0xff] %v789_v15  ;;  %v632_v27 = vadd.f32 %v631_v22, %v2307_v33  ;;  %v792_v28 = vpop.f32.mrb[2].mxu1  ;;  %v633_v30 = vpop.f32.mrb[3].mxu0 }
 0x17d   : > { %v793_v31 = vadd.f32 %v792_v28, %v2310_v37  ;;  %v634_v32 = vadd.f32 %v633_v30, %v2313_v41  ;;  %v794_v34 = vpop.f32.mrb[3].mxu1 }
 0x17e   : > { %1044 = vst [vmem:[%s2322_s17 + $0x10] sm:$0xff] %v632_v27  ;;  %v795_v35 = vadd.f32 %v794_v34, %v2316_v45 }
 0x17f   : > { %1076 = vst [vmem:[%s2327_s8 + $0x10] sm:$0xff] %v793_v31  ;;  %1045 = vst [vmem:[%s2322_s17 + $0x18] sm:$0xff] %v634_v32  ;;  %v637_v36 = vpop.f32.mrb[4].mxu0 }
 0x180   : > { %1077 = vst [vmem:[%s2327_s8 + $0x18] sm:$0xff] %v795_v35  ;;  %v638_v38 = vadd.f32 %v637_v36, %v2307_v33  ;;  %v798_v39 = vpop.f32.mrb[4].mxu1  ;;  %v639_v40 = vpop.f32.mrb[5].mxu0 }
 0x181   : > { %v799_v42 = vadd.f32 %v798_v39, %v2310_v37  ;;  %v640_v43 = vadd.f32 %v639_v40, %v2313_v41  ;;  %v800_v44 = vpop.f32.mrb[5].mxu1 }
 0x182   : > { %1046 = vst [vmem:[%s2322_s17 + $0x20] sm:$0xff] %v638_v38  ;;  %v801_v46 = vadd.f32 %v800_v44, %v2316_v45 }
 0x183   : > { %1078 = vst [vmem:[%s2327_s8 + $0x20] sm:$0xff] %v799_v42  ;;  %1047 = vst [vmem:[%s2322_s17 + $0x28] sm:$0xff] %v640_v43  ;;  %v643_v47 = vpop.f32.mrb[6].mxu0 }
 0x184   : > { %1079 = vst [vmem:[%s2327_s8 + $0x28] sm:$0xff] %v801_v46  ;;  %v644_v48 = vadd.f32 %v643_v47, %v2307_v33  ;;  %v804_v50 = vpop.f32.mrb[6].mxu1  ;;  %v645_v51 = vpop.f32.mrb[7].mxu0 }
 0x185   : > { %v805_v52 = vadd.f32 %v804_v50, %v2310_v37  ;;  %v646_v54 = vadd.f32 %v645_v51, %v2313_v41  ;;  %v806_v55 = vpop.f32.mrb[7].mxu1 }
 0x186   : > { %1048 = vst [vmem:[%s2322_s17 + $0x30] sm:$0xff] %v644_v48  ;;  %v807_v56 = vadd.f32 %v806_v55, %v2316_v45 }
 0x187   : > { %1080 = vst [vmem:[%s2327_s8 + $0x30] sm:$0xff] %v805_v52  ;;  %1049 = vst [vmem:[%s2322_s17 + $0x38] sm:$0xff] %v646_v54  ;;  %v649_v58 = vpop.f32.mrb[8].mxu0 }
 0x188   : > { %1081 = vst [vmem:[%s2327_s8 + $0x38] sm:$0xff] %v807_v56  ;;  %v650_v59 = vadd.f32 %v649_v58, %v2307_v33  ;;  %v810_v60 = vpop.f32.mrb[8].mxu1  ;;  %v651_v62 = vpop.f32.mrb[9].mxu0 }
 0x189   : > { %v811_v63 = vadd.f32 %v810_v60, %v2310_v37  ;;  %v652_v0 = vadd.f32 %v651_v62, %v2313_v41  ;;  %v812_v2 = vpop.f32.mrb[9].mxu1 }
 0x18a   : > { %1050 = vst [vmem:[%s2322_s17 + $0x40] sm:$0xff] %v650_v59  ;;  %v813_v3 = vadd.f32 %v812_v2, %v2316_v45 }
 0x18b   : > { %1082 = vst [vmem:[%s2327_s8 + $0x40] sm:$0xff] %v811_v63  ;;  %1051 = vst [vmem:[%s2322_s17 + $0x48] sm:$0xff] %v652_v0  ;;  %v655_v4 = vpop.f32.mrb[10].mxu0 }
 0x18c   : > { %1083 = vst [vmem:[%s2327_s8 + $0x48] sm:$0xff] %v813_v3  ;;  %v656_v6 = vadd.f32 %v655_v4, %v2307_v33  ;;  %v816_v7 = vpop.f32.mrb[10].mxu1  ;;  %v657_v9 = vpop.f32.mrb[11].mxu0 }
 0x18d   : > { %v817_v11 = vadd.f32 %v816_v7, %v2310_v37  ;;  %v658_v13 = vadd.f32 %v657_v9, %v2313_v41  ;;  %v818_v14 = vpop.f32.mrb[11].mxu1 }
 0x18e   : > { %1052 = vst [vmem:[%s2322_s17 + $0x50] sm:$0xff] %v656_v6  ;;  %v819_v18 = vadd.f32 %v818_v14, %v2316_v45 }
 0x18f   : > { %1084 = vst [vmem:[%s2327_s8 + $0x50] sm:$0xff] %v817_v11  ;;  %1053 = vst [vmem:[%s2322_s17 + $0x58] sm:$0xff] %v658_v13  ;;  %v661_v19 = vpop.f32.mrb[12].mxu0 }
 0x190   : > { %1085 = vst [vmem:[%s2327_s8 + $0x58] sm:$0xff] %v819_v18  ;;  %v662_v20 = vadd.f32 %v661_v19, %v2307_v33  ;;  %v822_v23 = vpop.f32.mrb[12].mxu1  ;;  %v663_v24 = vpop.f32.mrb[13].mxu0 }
 0x191   : > { %v823_v26 = vadd.f32 %v822_v23, %v2310_v37  ;;  %v664_v16 = vadd.f32 %v663_v24, %v2313_v41  ;;  %v824_v12 = vpop.f32.mrb[13].mxu1 }
 0x192   : > { %1054 = vst [vmem:[%s2322_s17 + $0x60] sm:$0xff] %v662_v20  ;;  %v825_v21 = vadd.f32 %v824_v12, %v2316_v45 }
 0x193   : > { %1086 = vst [vmem:[%s2327_s8 + $0x60] sm:$0xff] %v823_v26  ;;  %1055 = vst [vmem:[%s2322_s17 + $0x68] sm:$0xff] %v664_v16  ;;  %v667_v25 = vpop.f32.mrb[14].mxu0 }
 0x194   : > { %1087 = vst [vmem:[%s2327_s8 + $0x68] sm:$0xff] %v825_v21  ;;  %v668_v29 = vadd.f32 %v667_v25, %v2307_v33  ;;  %v828_v49 = vpop.f32.mrb[14].mxu1  ;;  %v669_v53 = vpop.f32.mrb[15].mxu0 }
 0x195   : > { %v829_v57 = vadd.f32 %v828_v49, %v2310_v37  ;;  %v670_v61 = vadd.f32 %v669_v53, %v2313_v41  ;;  %v830_v1 = vpop.f32.mrb[15].mxu1  ;;  %v547_v49 = vsub.s32 4, %v2295_v8 }
 0x196   : > { %1056 = vst [vmem:[%s2322_s17 + $0x70] sm:$0xff] %v668_v29  ;;  %v831_v5 = vadd.f32 %v830_v1, %v2316_v45  ;;  %v551_v1 = vsub.s32 5, %v2295_v8 }
 0x197   : > { %1088 = vst [vmem:[%s2327_s8 + $0x70] sm:$0xff] %v829_v57  ;;  %1057 = vst [vmem:[%s2322_s17 + $0x78] sm:$0xff] %v670_v61  ;;  %v673_v10 = vpop.f32.mrb[16].mxu0 }
 0x198   : > { %1089 = vst [vmem:[%s2327_s8 + $0x78] sm:$0xff] %v831_v5  ;;  %v674_v15 = vadd.f32 %v673_v10, %v2307_v33  ;;  %v834_v22 = vpop.f32.mrb[16].mxu1  ;;  %v675_v27 = vpop.f32.mrb[17].mxu0 }
 0x199   : > { %v835_v28 = vadd.f32 %v834_v22, %v2310_v37  ;;  %v676_v30 = vadd.f32 %v675_v27, %v2313_v41  ;;  %v836_v31 = vpop.f32.mrb[17].mxu1  ;;  %v2454_v27 = vrot.slane %v2301_v17, %v547_v49 }
 0x19a   : > { %1058 = vst [vmem:[%s2322_s17 + $0x80] sm:$0xff] %v674_v15  ;;  %v837_v32 = vadd.f32 %v836_v31, %v2316_v45 }
 0x19b   : > { %1090 = vst [vmem:[%s2327_s8 + $0x80] sm:$0xff] %v835_v28  ;;  %1059 = vst [vmem:[%s2322_s17 + $0x88] sm:$0xff] %v676_v30  ;;  %v679_v34 = vpop.f32.mrb[18].mxu0 }
 0x19c   : > { %1091 = vst [vmem:[%s2327_s8 + $0x88] sm:$0xff] %v837_v32  ;;  %v680_v35 = vadd.f32 %v679_v34, %v2307_v33  ;;  %v840_v36 = vpop.f32.mrb[18].mxu1  ;;  %v681_v38 = vpop.f32.mrb[19].mxu0  ;;  %v2459_v32 = vrot.slane %v2301_v17, %v551_v1 }
 0x19d   : > { %v841_v39 = vadd.f32 %v840_v36, %v2310_v37  ;;  %v682_v40 = vadd.f32 %v681_v38, %v2313_v41  ;;  %v842_v42 = vpop.f32.mrb[19].mxu1 }
 0x19e   : > { %1060 = vst [vmem:[%s2322_s17 + $0x90] sm:$0xff] %v680_v35  ;;  %v843_v43 = vadd.f32 %v842_v42, %v2316_v45 }
 0x19f   : > { %1092 = vst [vmem:[%s2327_s8 + $0x90] sm:$0xff] %v841_v39  ;;  %1061 = vst [vmem:[%s2322_s17 + $0x98] sm:$0xff] %v682_v40  ;;  %v685_v44 = vpop.f32.mrb[20].mxu0 }
 0x1a0   : > { %1093 = vst [vmem:[%s2327_s8 + $0x98] sm:$0xff] %v843_v43  ;;  %v686_v46 = vadd.f32 %v685_v44, %v2307_v33  ;;  %v846_v47 = vpop.f32.mrb[20].mxu1  ;;  %v687_v48 = vpop.f32.mrb[21].mxu0 }
 0x1a1   : > { %v847_v50 = vadd.f32 %v846_v47, %v2310_v37  ;;  %v688_v51 = vadd.f32 %v687_v48, %v2313_v41  ;;  %v848_v52 = vpop.f32.mrb[21].mxu1 }
 0x1a2   : > { %1062 = vst [vmem:[%s2322_s17 + $0xa0] sm:$0xff] %v686_v46  ;;  %v849_v54 = vadd.f32 %v848_v52, %v2316_v45 }
 0x1a3   : > { %1094 = vst [vmem:[%s2327_s8 + $0xa0] sm:$0xff] %v847_v50  ;;  %1063 = vst [vmem:[%s2322_s17 + $0xa8] sm:$0xff] %v688_v51  ;;  %v691_v55 = vpop.f32.mrb[22].mxu0 }
 0x1a4   : > { %1095 = vst [vmem:[%s2327_s8 + $0xa8] sm:$0xff] %v849_v54  ;;  %v692_v56 = vadd.f32 %v691_v55, %v2307_v33  ;;  %v852_v58 = vpop.f32.mrb[22].mxu1  ;;  %v693_v59 = vpop.f32.mrb[23].mxu0 }
 0x1a5   : > { %v853_v60 = vadd.f32 %v852_v58, %v2310_v37  ;;  %v694_v62 = vadd.f32 %v693_v59, %v2313_v41  ;;  %v854_v63 = vpop.f32.mrb[23].mxu1 }
 0x1a6   : > { %1064 = vst [vmem:[%s2322_s17 + $0xb0] sm:$0xff] %v692_v56  ;;  %v855_v0 = vadd.f32 %v854_v63, %v2316_v45 }
 0x1a7   : > { %1096 = vst [vmem:[%s2327_s8 + $0xb0] sm:$0xff] %v853_v60  ;;  %1065 = vst [vmem:[%s2322_s17 + $0xb8] sm:$0xff] %v694_v62  ;;  %v697_v2 = vpop.f32.mrb[24].mxu0 }
 0x1a8   : > { %1097 = vst [vmem:[%s2327_s8 + $0xb8] sm:$0xff] %v855_v0  ;;  %v698_v3 = vadd.f32 %v697_v2, %v2307_v33  ;;  %v858_v4 = vpop.f32.mrb[24].mxu1  ;;  %v699_v6 = vpop.f32.mrb[25].mxu0 }
 0x1a9   : > { %v859_v7 = vadd.f32 %v858_v4, %v2310_v37  ;;  %v700_v9 = vadd.f32 %v699_v6, %v2313_v41  ;;  %v860_v11 = vpop.f32.mrb[25].mxu1 }
 0x1aa   : > { %1066 = vst [vmem:[%s2322_s17 + $0xc0] sm:$0xff] %v698_v3  ;;  %v861_v13 = vadd.f32 %v860_v11, %v2316_v45 }
 0x1ab   : > { %1098 = vst [vmem:[%s2327_s8 + $0xc0] sm:$0xff] %v859_v7  ;;  %1067 = vst [vmem:[%s2322_s17 + $0xc8] sm:$0xff] %v700_v9  ;;  %v703_v14 = vpop.f32.mrb[26].mxu0 }
 0x1ac   : > { %1099 = vst [vmem:[%s2327_s8 + $0xc8] sm:$0xff] %v861_v13  ;;  %v704_v18 = vadd.f32 %v703_v14, %v2307_v33  ;;  %v864_v19 = vpop.f32.mrb[26].mxu1  ;;  %v705_v20 = vpop.f32.mrb[27].mxu0 }
 0x1ad   : > { %v865_v23 = vadd.f32 %v864_v19, %v2310_v37  ;;  %v706_v24 = vadd.f32 %v705_v20, %v2313_v41  ;;  %v866_v26 = vpop.f32.mrb[27].mxu1 }
 0x1ae   : > { %1068 = vst [vmem:[%s2322_s17 + $0xd0] sm:$0xff] %v704_v18  ;;  %v867_v16 = vadd.f32 %v866_v26, %v2316_v45 }
 0x1af   : > { %1100 = vst [vmem:[%s2327_s8 + $0xd0] sm:$0xff] %v865_v23  ;;  %1069 = vst [vmem:[%s2322_s17 + $0xd8] sm:$0xff] %v706_v24  ;;  %v709_v12 = vpop.f32.mrb[28].mxu0 }
 0x1b0   : > { %1101 = vst [vmem:[%s2327_s8 + $0xd8] sm:$0xff] %v867_v16  ;;  %v710_v21 = vadd.f32 %v709_v12, %v2307_v33  ;;  %v870_v25 = vpop.f32.mrb[28].mxu1  ;;  %v711_v29 = vpop.f32.mrb[29].mxu0 }
 0x1b1   : > { %v871_v53 = vadd.f32 %v870_v25, %v2310_v37  ;;  %v712_v57 = vadd.f32 %v711_v29, %v2313_v41  ;;  %v872_v61 = vpop.f32.mrb[29].mxu1 }
 0x1b2   : > { %1070 = vst [vmem:[%s2322_s17 + $0xe0] sm:$0xff] %v710_v21  ;;  %v873_v5 = vadd.f32 %v872_v61, %v2316_v45 }
 0x1b3   : > { %1102 = vst [vmem:[%s2327_s8 + $0xe0] sm:$0xff] %v871_v53  ;;  %1071 = vst [vmem:[%s2322_s17 + $0xe8] sm:$0xff] %v712_v57  ;;  %v715_v10 = vpop.f32.mrb[30].mxu0 }
 0x1b4   : > { %1103 = vst [vmem:[%s2327_s8 + $0xe8] sm:$0xff] %v873_v5  ;;  %v716_v15 = vadd.f32 %v715_v10, %v2307_v33  ;;  %v876_v22 = vpop.f32.mrb[30].mxu1  ;;  %v717_v8 = vpop.f32.mrb[31].mxu0 }
 0x1b5   : > { %v877_v28 = vadd.f32 %v876_v22, %v2310_v37  ;;  %v718_v30 = vadd.f32 %v717_v8, %v2313_v41  ;;  %v878_v31 = vpop.f32.mrb[31].mxu1 }
 0x1b6   : > { %1072 = vst [vmem:[%s2322_s17 + $0xf0] sm:$0xff] %v716_v15  ;;  %v879_v33 = vadd.f32 %v878_v31, %v2316_v45 }
 0x1b7   : > { %1104 = vst [vmem:[%s2327_s8 + $0xf0] sm:$0xff] %v877_v28  ;;  %1073 = vst [vmem:[%s2322_s17 + $0xf8] sm:$0xff] %v718_v30  ;;  %v947_v17 = vpop.f32.mrb[32].mxu0 }
 0x1b8   : > { %1105 = vst [vmem:[%s2327_s8 + $0xf8] sm:$0xff] %v879_v33  ;;  %v948_v37 = vadd.f32 %v947_v17, %v2454_v27  ;;  %v995_v41 = vpop.f32.mrb[32].mxu1  ;;  %v949_v34 = vpop.f32.mrb[33].mxu0 }
 0x1b9   : > { %1780 = shalt.err (!%p1777_p9)
}
 0x1ba   : > { %s1781_s17 = scalar_lea.hbm %s2465_s12, 4096  ;;  %s1785_s14 = scalar_lea.hbm %s2667_s3, 8192 }
 0x1bb   : > { %p1782_p1 = scmp.ne.s32.totalorder %s2465_s12, %s1781_s17  ;;  %p1786_p7 = scmp.lt.u32.totalorder %s2465_s12, %s2667_s3 }
 0x1bc   : > { %p1787_p13 = scmp.lt.u32.totalorder %s1785_s14, %s1781_s17  ;;  %p1789_p6 = scmp.lt.u32.totalorder %s1781_s17, %s2465_s12 }
 0x1bd   : > { %p1783_p2 = pnand %p1782_p1, %p2050_p10 }
 0x1be   : > { %p1788_p4 = por %p1787_p13, %p1786_p7 }
 0x1bf   : > { %p1784_p3 = pneg %p1783_p2 }
 0x1c0   : > { %p1790_p8 = por %p1789_p6, %p1788_p4 }
 0x1c2   : > { %p1791_p12 = pnand %p1790_p8, %p1784_p3 }
 0x1c4   : > { %1794 = shalt.err (!%p1791_p12)
}
 0x1c5   : > { %s1922_s25 = smov 256   ;;  %s1923_s6 = smov 16   ;;  %v996_v45 = vadd.f32 %v995_v41, %v2454_v27  ;;  %v950_v35 = vadd.f32 %v949_v34, %v2459_v32  ;;  %v997_v36 = vpop.f32.mrb[33].mxu1 }
 0x1c6   : > { %s2688_s21 = scalar_lea.sflag [#allocation4], %s2106_s29  ;;  %s2689_s10 = sand.u32 1, %s1987_s24  }
 0x1c7   : > { %1626 = dma.vmem_to_hbm [thread:$0]  (%p2050_p10), %s2467_s16, 4096, %s2465_s12, %s2688_s21, %s1922_s25, %s1922_s25, %s1923_s6  }
 0x1c8   : > { %s2514_s17 = scalar_lea.sflag [#allocation9], %s2689_s10  ;;  %s1795_s8 = scalar_lea.vmem %s2477_s15, 4096 }
 0x1c9   : > { %p1796_p11 = scmp.ne.s32.totalorder %s2477_s15, %s1795_s8  ;;  %s1924_s14 = smov [#allocation8]  }
 0x1ca   : > { %s1799_s26 = sshll.u32 %s1924_s14, 4  ;;  %s1800_s26 = int_to_ptr.vmem [resolvable:$false] %s1799_s26 }
 0x1cb   : > { %p1797_p0 = pnand %p1796_p11, %p2050_p10  ;;  %s1801_s0 = scalar_lea.vmem %s1800_s26, 8192 }
 0x1cc   : > { %p1802_p9 = scmp.lt.s32.totalorder %s2477_s15, %s1800_s26  ;;  %p1803_p1 = scmp.lt.s32.totalorder %s1801_s0, %s1795_s8 }
 0x1cd   : > { %p1798_p5 = pneg %p1797_p0 }
 0x1ce   : > { %p1804_p2 = por %p1803_p1, %p1802_p9 }
 0x1d0   : > { %p1805_p3 = pnand %p1804_p2, %p1798_p5 }
 0x1d2   : > { %1808 = shalt.err (!%p1805_p3)
}
 0x1d3   : > { %s1809_s24 = scalar_lea.hbm %s2475_s28, 4096  ;;  %s1813_s12 = scalar_lea.hbm %s2668_s4, 8192 }
 0x1d4   : > { %p1810_p7 = scmp.ne.s32.totalorder %s2475_s28, %s1809_s24  ;;  %p1814_p6 = scmp.lt.u32.totalorder %s2475_s28, %s2668_s4 }
 0x1d5   : > { %p1815_p8 = scmp.lt.u32.totalorder %s1813_s12, %s1809_s24  ;;  %p1817_p11 = scmp.lt.u32.totalorder %s1809_s24, %s2475_s28 }
 0x1d6   : > { %p1811_p13 = pnand %p1810_p7, %p2050_p10 }
 0x1d7   : > { %p1816_p12 = por %p1815_p8, %p1814_p6 }
 0x1d8   : > { %p1812_p4 = pneg %p1811_p13 }
 0x1d9   : > { %p1818_p0 = por %p1817_p11, %p1816_p12 }
 0x1db   : > { %p1819_p5 = pnand %p1818_p0, %p1812_p4 }
 0x1dd   : > { %1822 = shalt.err (!%p1819_p5)
}
 0x1de   : > { %1627 = dma.vmem_to_hbm [thread:$0]  (%p2050_p10), %s2477_s15, 4096, %s2475_s28, %s2514_s17, %s1922_s25, %s1922_s25, %s1923_s6   ;;  %v998_v38 = vadd.f32 %v997_v36, %v2459_v32  ;;  %v953_v39 = vpop.f32.mrb[34].mxu0  ;;  %v1001_v42 = vpop.f32.mrb[34].mxu1 }
 0x1df   : > { %s2542_s0 = scalar_lea.vmem [#allocation10], %s2109_s30  ;;  %v954_v40 = vadd.f32 %v953_v39, %v2454_v27  ;;  %v955_v43 = vpop.f32.mrb[35].mxu0  ;;  %v1002_v44 = vadd.f32 %v1001_v42, %v2454_v27  ;;  %v1003_v47 = vpop.f32.mrb[35].mxu1  ;;  %s2607_s8 = scalar_lea.hbm %s2669_s5, %s2443_s9 }
 0x1e0   : > { %1106 = vst [vmem:[%s2542_s0] sm:$0xff] %v948_v37  ;;  %1122 = vst [vmem:[%s2542_s0 + $0x80] sm:$0xff] %v996_v45  ;;  %v956_v46 = vadd.f32 %v955_v43, %v2459_v32  ;;  %v1004_v48 = vadd.f32 %v1003_v47, %v2459_v32  ;;  %v959_v50 = vpop.f32.mrb[36].mxu0  ;;  %v1007_v52 = vpop.f32.mrb[36].mxu1  ;;  %s1203_s30 = sshll.u32 %s2542_s0, 4  ;;  %s1925_s26 = smov [#allocation10]   ;;  %s2609_s30 = int_to_ptr.vmem [resolvable:$true] %s1203_s30 }
 0x1e1   : > { %1107 = vst [vmem:[%s2542_s0 + $0x8] sm:$0xff] %v950_v35  ;;  %1123 = vst [vmem:[%s2542_s0 + $0x88] sm:$0xff] %v998_v38  ;;  %v960_v51 = vadd.f32 %v959_v50, %v2454_v27  ;;  %v961_v54 = vpop.f32.mrb[37].mxu0  ;;  %v1008_v55 = vadd.f32 %v1007_v52, %v2454_v27  ;;  %v1009_v58 = vpop.f32.mrb[37].mxu1  ;;  %s1823_s14 = scalar_lea.vmem %s2609_s30, 4096  ;;  %s1827_s24 = sshll.u32 %s1925_s26, 4  ;;  %s1828_s24 = int_to_ptr.vmem [resolvable:$false] %s1827_s24 }
 0x1e2   : > { %1108 = vst [vmem:[%s2542_s0 + $0x10] sm:$0xff] %v954_v40  ;;  %1124 = vst [vmem:[%s2542_s0 + $0x90] sm:$0xff] %v1002_v44  ;;  %v962_v56 = vadd.f32 %v961_v54, %v2459_v32  ;;  %v1010_v59 = vadd.f32 %v1009_v58, %v2459_v32  ;;  %v965_v60 = vpop.f32.mrb[38].mxu0  ;;  %v1013_v63 = vpop.f32.mrb[38].mxu1  ;;  %p1824_p9 = scmp.ne.s32.totalorder %s2609_s30, %s1823_s14  ;;  %s1829_s29 = scalar_lea.vmem %s1828_s24, 8192 }
 0x1e3   : > { %1109 = vst [vmem:[%s2542_s0 + $0x18] sm:$0xff] %v956_v46  ;;  %1125 = vst [vmem:[%s2542_s0 + $0x98] sm:$0xff] %v1004_v48  ;;  %v966_v62 = vadd.f32 %v965_v60, %v2454_v27  ;;  %v967_v0 = vpop.f32.mrb[39].mxu0  ;;  %v1014_v2 = vadd.f32 %v1013_v63, %v2454_v27  ;;  %v1015_v4 = vpop.f32.mrb[39].mxu1  ;;  %p1830_p3 = scmp.lt.s32.totalorder %s2609_s30, %s1828_s24  ;;  %p1831_p7 = scmp.lt.s32.totalorder %s1829_s29, %s1823_s14 }
 0x1e4   : > { %1110 = vst [vmem:[%s2542_s0 + $0x20] sm:$0xff] %v960_v51  ;;  %1126 = vst [vmem:[%s2542_s0 + $0xa0] sm:$0xff] %v1008_v55  ;;  %v968_v3 = vadd.f32 %v967_v0, %v2459_v32  ;;  %v1016_v6 = vadd.f32 %v1015_v4, %v2459_v32  ;;  %v971_v7 = vpop.f32.mrb[40].mxu0  ;;  %v1019_v11 = vpop.f32.mrb[40].mxu1  ;;  %p1825_p1 = pnand %p1824_p9, %p2050_p10 }
 0x1e5   : > { %1111 = vst [vmem:[%s2542_s0 + $0x28] sm:$0xff] %v962_v56  ;;  %1127 = vst [vmem:[%s2542_s0 + $0xa8] sm:$0xff] %v1010_v59  ;;  %v972_v9 = vadd.f32 %v971_v7, %v2454_v27  ;;  %v973_v13 = vpop.f32.mrb[41].mxu0  ;;  %v1020_v14 = vadd.f32 %v1019_v11, %v2454_v27  ;;  %v1021_v19 = vpop.f32.mrb[41].mxu1  ;;  %p1832_p13 = por %p1831_p7, %p1830_p3 }
 0x1e6   : > { %1112 = vst [vmem:[%s2542_s0 + $0x30] sm:$0xff] %v966_v62  ;;  %1128 = vst [vmem:[%s2542_s0 + $0xb0] sm:$0xff] %v1014_v2  ;;  %v974_v18 = vadd.f32 %v973_v13, %v2459_v32  ;;  %v1022_v20 = vadd.f32 %v1021_v19, %v2459_v32  ;;  %v977_v23 = vpop.f32.mrb[42].mxu0  ;;  %v1025_v26 = vpop.f32.mrb[42].mxu1  ;;  %p1826_p2 = pneg %p1825_p1 }
 0x1e7   : > { %1113 = vst [vmem:[%s2542_s0 + $0x38] sm:$0xff] %v968_v3  ;;  %1129 = vst [vmem:[%s2542_s0 + $0xb8] sm:$0xff] %v1016_v6  ;;  %v978_v24 = vadd.f32 %v977_v23, %v2454_v27  ;;  %v979_v16 = vpop.f32.mrb[43].mxu0  ;;  %v1026_v12 = vadd.f32 %v1025_v26, %v2454_v27  ;;  %v1027_v25 = vpop.f32.mrb[43].mxu1 }
 0x1e8   : > { %1114 = vst [vmem:[%s2542_s0 + $0x40] sm:$0xff] %v972_v9  ;;  %1130 = vst [vmem:[%s2542_s0 + $0xc0] sm:$0xff] %v1020_v14  ;;  %v980_v21 = vadd.f32 %v979_v16, %v2459_v32  ;;  %v1028_v29 = vadd.f32 %v1027_v25, %v2459_v32  ;;  %v983_v49 = vpop.f32.mrb[44].mxu0  ;;  %v1031_v57 = vpop.f32.mrb[44].mxu1  ;;  %p1833_p4 = pnand %p1832_p13, %p1826_p2 }
 0x1e9   : > { %1115 = vst [vmem:[%s2542_s0 + $0x48] sm:$0xff] %v974_v18  ;;  %1131 = vst [vmem:[%s2542_s0 + $0xc8] sm:$0xff] %v1022_v20  ;;  %v984_v53 = vadd.f32 %v983_v49, %v2454_v27  ;;  %v985_v61 = vpop.f32.mrb[45].mxu0  ;;  %v1032_v1 = vadd.f32 %v1031_v57, %v2454_v27  ;;  %v1033_v10 = vpop.f32.mrb[45].mxu1 }
 0x1ea   : > { %1116 = vst [vmem:[%s2542_s0 + $0x50] sm:$0xff] %v978_v24  ;;  %1132 = vst [vmem:[%s2542_s0 + $0xd0] sm:$0xff] %v1026_v12  ;;  %v986_v5 = vadd.f32 %v985_v61, %v2459_v32  ;;  %v1034_v15 = vadd.f32 %v1033_v10, %v2459_v32  ;;  %v989_v22 = vpop.f32.mrb[46].mxu0  ;;  %v1037_v28 = vpop.f32.mrb[46].mxu1 }
 0x1eb   : > { %1117 = vst [vmem:[%s2542_s0 + $0x58] sm:$0xff] %v980_v21  ;;  %1133 = vst [vmem:[%s2542_s0 + $0xd8] sm:$0xff] %v1028_v29  ;;  %v990_v8 = vadd.f32 %v989_v22, %v2454_v27  ;;  %v991_v30 = vpop.f32.mrb[47].mxu0  ;;  %v1038_v31 = vadd.f32 %v1037_v28, %v2454_v27  ;;  %v1039_v17 = vpop.f32.mrb[47].mxu1 }
 0x1ec   : > { %1118 = vst [vmem:[%s2542_s0 + $0x60] sm:$0xff] %v984_v53  ;;  %1134 = vst [vmem:[%s2542_s0 + $0xe0] sm:$0xff] %v1032_v1  ;;  %v992_v33 = vadd.f32 %v991_v30, %v2459_v32  ;;  %v1040_v37 = vadd.f32 %v1039_v17, %v2459_v32 }
 0x1ed   : > { %1119 = vst [vmem:[%s2542_s0 + $0x68] sm:$0xff] %v986_v5  ;;  %1135 = vst [vmem:[%s2542_s0 + $0xe8] sm:$0xff] %v1034_v15 }
 0x1ee   : > { %1120 = vst [vmem:[%s2542_s0 + $0x70] sm:$0xff] %v990_v8  ;;  %1136 = vst [vmem:[%s2542_s0 + $0xf0] sm:$0xff] %v1038_v31 }
 0x1ef   : > { %1121 = vst [vmem:[%s2542_s0 + $0x78] sm:$0xff] %v992_v33  ;;  %1137 = vst [vmem:[%s2542_s0 + $0xf8] sm:$0xff] %v1040_v37 }
 0x1f0   : > { %1836 = shalt.err (!%p1833_p4)
}
 0x1f1   : > { %s1837_s9 = scalar_lea.hbm %s2607_s8, 4096  ;;  %s1841_s21 = scalar_lea.hbm %s2669_s5, 8192 }
 0x1f2   : > { %p1838_p6 = scmp.ne.s32.totalorder %s2607_s8, %s1837_s9  ;;  %p1842_p11 = scmp.lt.u32.totalorder %s2607_s8, %s2669_s5 }
 0x1f3   : > { %p1843_p0 = scmp.lt.u32.totalorder %s1841_s21, %s1837_s9  ;;  %p1845_p9 = scmp.lt.u32.totalorder %s1837_s9, %s2607_s8 }
 0x1f4   : > { %p1839_p8 = pnand %p1838_p6, %p2050_p10 }
 0x1f5   : > { %p1844_p5 = por %p1843_p0, %p1842_p11 }
 0x1f6   : > { %p1840_p12 = pneg %p1839_p8 }
 0x1f7   : > { %p1846_p1 = por %p1845_p9, %p1844_p5 }
 0x1f9   : > { %p1847_p2 = pnand %p1846_p1, %p1840_p12 }
 0x1fb   : > { %1850 = shalt.err (!%p1847_p2)
}
 0x1fc   : > { %1628 = dma.vmem_to_hbm [thread:$0]  (%p2050_p10), %s2609_s30, 4096, %s2607_s8, %s2514_s17, %s1922_s25, %s1922_s25, %s1923_s6  }
 0x1fd PF: > { %s1218_s15 = sand.u32 1, %s1893_s18   ;;  %p2690_p3 = scmp.ne.s32.totalorder %s2676_s27, 0 }
 0x1fe   : > { %p2691_p7 = scmp.ge.s32.totalorder %s1913_s23, 2  ;;  %s1219_s28 = scalar_lea.sflag [#allocation4], %s1218_s15 }
 0x200   : > { %p1641_p13 = pnand %p2691_p7, %p2690_p3 }
 0x202   : > { %1884 = dma.done.wait (!%p1641_p13), %s1219_s28, 4096  }
 0x203   : > { %1886 = vsyncadd (!%p1641_p13), %s1219_s28, 4294963200  ;;  %s2692_s11 = sadd.s32 4294967294, %s1913_s23  }
 0x204   : > { %s1227_s14 = sand.u32 1, %s2692_s11  }
 0x205   : > { %s1228_s26 = scalar_lea.sflag [#allocation9], %s1227_s14 }
 0x206   : > { %1888 = dma.done.wait (!%p1641_p13), %s1228_s26, 8192  }
 0x207   : > { %1890 = vsyncadd (!%p1641_p13), %s1228_s26, 4294959104  ;;  %s26_s23 = sadd.s32 1, %s1913_s23   ;;  %s2693_s18 = smov %s1897_s19 }
 0x208   : > { %p23_p10 = scmp.ge.s32.totalorder %s26_s23, 4   ;;  %s2694_s19 = smov %s1901_s20 }
 0x209   : > { %s2695_s20 = smov %s2059_s13  ;;  %s2696_s21 = smov %s1909_s22 }
 0x20a   : > { %s2697_s22 = smov %s2699_s7  ;;  %25 = sbr.rel (!%p23_p10) target bundleno = 11 (0xb), region = 113 }
 0x211   :  { %1242 = vsyncpa [#allocation3], 1 }
 0x212   :  { %1244 = vsyncpa [#allocation3 + $0x1], 1 }
 0x213   :  { %1245 = vsyncpa [#allocation6], 1 }
 0x214   :  { %1246 = vsyncpa [#allocation4], 1 }
 0x215   :  { %1248 = vsyncpa [#allocation4 + $0x1], 1 }
 0x216   :  { %1249 = vsyncpa [#allocation9], 1 }
 0x217   :  { %1251 = vsyncpa [#allocation9 + $0x1], 1 }

</bundles_post_ra>
